<compile_context>
chip_gen: v7x
topology: tpu7x:2x2x1
jax: 0.10.0
libtpu: 0.0.40
codegen_flags: <defaults>
</compile_context>

<pallas_src>
import functools
import math

import jax
import jax.numpy as jnp
from jax.experimental import pallas as pl
from jax.experimental.pallas import tpu as pltpu

_LN_EPS = 1e-5


# ----------------------------------------------------------------------------
# Helpers
# ----------------------------------------------------------------------------
def _vmem_limit_bytes() -> int:
    """~75% of per-core VMEM (96 MiB v5e/v6e, 48 MiB v7x), with a safe fallback."""
    cap = 128 * 1024 * 1024
    try:
        cap = int(pltpu.get_tpu_info().vmem_capacity_bytes)
    except Exception:
        pass
    return max(32 * 1024 * 1024, min((cap * 3) // 4, 100 * 1024 * 1024))


def _const_spec(shape, single_buffer: bool) -> pl.BlockSpec:
    """BlockSpec for a weight that is identical for every grid step."""
    index_map = lambda *_: (0,) * len(shape)
    if single_buffer:
        # Constant block index -> double buffering only wastes VMEM.
        return pl.BlockSpec(shape, index_map, pipeline_mode=pl.Buffered(1))
    return pl.BlockSpec(shape, index_map)


def _pick_q_tile(seq: int, target: int = 128) -> int:
    """Largest divisor of `seq` that is <= target (prefer multiples of 8)."""
    if seq <= target:
        return seq
    for t in range(target, 7, -1):
        if seq % t == 0 and t % 8 == 0:
            return t
    for t in range(target, 0, -1):
        if seq % t == 0:
            return t
    return seq


def _pick_row_tile(rows: int, target: int) -> int:
    if rows <= target:
        return rows
    return max(8, (target // 8) * 8)       # partial last tile handled by pl.cdiv


# ----------------------------------------------------------------------------
# Kernels
# ----------------------------------------------------------------------------
def _attn_residual_kernel(x_full_ref, x_q_ref, ln1w_ref, ln1b_ref,
                          wq_ref, bq_ref, wkv_ref, bkv_ref, wo_ref, bo_ref,
                          y_ref, k_sc, v_sc, *, n_head: int, eps: float):
    """Grid step (b, qt): y[b, qt-tile] = x + out_proj(MHA(LN1(x)))[qt-tile]."""
    H = n_head
    S = x_full_ref.shape[1]
    D = x_full_ref.shape[2]
    dh = D // H
    scale = 1.0 / math.sqrt(dh)

    def layer_norm(z):
        mu = jnp.mean(z, axis=-1, keepdims=True)
        zc = z - mu
        var = jnp.mean(zc * zc, axis=-1, keepdims=True)
        return zc * jax.lax.rsqrt(var + eps) * ln1w_ref[0] + ln1b_ref[0]

    # --- K / V for the full sequence, computed once per batch element --------
    @pl.when(pl.program_id(1) == 0)
    def _():
        xf = x_full_ref[0].astype(jnp.float32)                         # (S, D)
        xn = layer_norm(xf)
        kv = jnp.dot(xn.astype(jnp.bfloat16), wkv_ref[...],
                     preferred_element_type=jnp.float32) + bkv_ref[0]  # (S, 2D)
        # lane-concat -> head-major (H, S, dh), stored as bf16 residents
        k_sc[...] = jnp.stack(
            [kv[:, h * dh:(h + 1) * dh] for h in range(H)], axis=0
        ).astype(k_sc.dtype)
        v_sc[...] = jnp.stack(
            [kv[:, D + h * dh:D + (h + 1) * dh] for h in range(H)], axis=0
        ).astype(v_sc.dtype)

    # --- query tile -----------------------------------------------------------
    xq = x_q_ref[0].astype(jnp.float32)                                 # (tq, D)
    xnq = layer_norm(xq)
    q = jnp.dot(xnq.astype(jnp.bfloat16), wq_ref[...],
                preferred_element_type=jnp.float32) + bq_ref[0]         # (tq, D)
    q_hm = jnp.stack([q[:, h * dh:(h + 1) * dh] for h in range(H)],
                     axis=0).astype(jnp.bfloat16)                       # (H, tq, dh)

    s = jnp.einsum("hqd,hkd->hqk", q_hm, k_sc[...],
                   preferred_element_type=jnp.float32) * scale          # (H, tq, S)
    s = s - jnp.max(s, axis=-1, keepdims=True)
    p = jnp.exp(s)
    inv_l = pl.reciprocal(jnp.sum(p, axis=-1, keepdims=True), approx=True)
    ctx = jnp.einsum("hqk,hkd->hqd", p.astype(jnp.bfloat16), v_sc[...],
                     preferred_element_type=jnp.float32) * inv_l        # (H, tq, dh)

    # head-major -> lane-concat, then ONE K=D output projection
    ctx_cat = jnp.concatenate([ctx[h] for h in range(H)], axis=-1)      # (tq, D)
    attn = jnp.dot(ctx_cat.astype(jnp.bfloat16), wo_ref[...],
                   preferred_element_type=jnp.float32) + bo_ref[0]

    # residual (attention / residual dropout are identity in eval mode)
    y_ref[0] = (xq + attn).astype(y_ref.dtype)


def _mlp_residual_kernel(y_ref, ln2w_ref, ln2b_ref, w1_ref, b1_ref,
                         w2_ref, b2_ref, o_ref, *, eps: float):
    """Row tile of flattened tokens: o = y + W2 @ GELU(W1 @ LN2(y))."""
    y = y_ref[...].astype(jnp.float32)                                  # (tr, D)
    mu = jnp.mean(y, axis=-1, keepdims=True)
    yc = y - mu
    var = jnp.mean(yc * yc, axis=-1, keepdims=True)
    yn = yc * jax.lax.rsqrt(var + eps) * ln2w_ref[0] + ln2b_ref[0]

    h = jnp.dot(yn.astype(jnp.bfloat16), w1_ref[...],
                preferred_element_type=jnp.float32) + b1_ref[0]
    # exact (erf) GELU, matching torch.nn.GELU() default
    h = 0.5 * h * (1.0 + jax.lax.erf(h * (1.0 / math.sqrt(2.0))))
    m = jnp.dot(h.astype(jnp.bfloat16), w2_ref[...],
                preferred_element_type=jnp.float32) + b2_ref[0]

    # residual (MLP dropout is identity in eval mode)
    o_ref[...] = (y + m).astype(o_ref.dtype)


# ----------------------------------------------------------------------------
# Wrapper
# ----------------------------------------------------------------------------
def _forward(x, p, *, n_head: int, eps: float, aggressive: bool):
    B, S, D = x.shape
    assert D % n_head == 0
    dh = D // n_head

    vmem_limit = _vmem_limit_bytes()
    cs = functools.partial(_const_spec, single_buffer=aggressive)

    if aggressive:
        cp1 = pltpu.CompilerParams(dimension_semantics=("parallel", "arbitrary"),
                                   vmem_limit_bytes=vmem_limit)
        cp2 = pltpu.CompilerParams(dimension_semantics=("parallel",),
                                   vmem_limit_bytes=vmem_limit)
    else:  # conservative fallback: default buffering, default vmem limit
        cp1 = pltpu.CompilerParams(dimension_semantics=("parallel", "arbitrary"))
        cp2 = pltpu.CompilerParams(dimension_semantics=("parallel",))

    # bf16 copies of the big matmul weights (VMEM residents); biases / LN stay f32.
    wq = p["wq"].astype(jnp.bfloat16)
    wkv = jnp.concatenate([p["wk"], p["wv"]], axis=1).astype(jnp.bfloat16)
    wo = p["wo"].astype(jnp.bfloat16)
    w1 = p["w1"].astype(jnp.bfloat16)
    w2 = p["w2"].astype(jnp.bfloat16)
    bkv = jnp.concatenate([p["bk"], p["bv"]], axis=1)

    # ---- Stage 1: LN1 + MHA + residual; grid=(B, S//tq), K/V resident -------
    # qt axis must stay "arbitrary": K/V scratch is produced at qt==0 per batch.
    tq = _pick_q_tile(S)
    stage1 = pl.pallas_call(
        functools.partial(_attn_residual_kernel, n_head=n_head, eps=eps),
        out_shape=jax.ShapeDtypeStruct((B, S, D), x.dtype),
        grid_spec=pltpu.PrefetchScalarGridSpec(
            num_scalar_prefetch=0,
            grid=(B, S // tq),
            in_specs=[
                pl.BlockSpec((1, S, D), lambda b, qt: (b, 0, 0)),   # x (full seq, resident per b)
                pl.BlockSpec((1, tq, D), lambda b, qt: (b, qt, 0)),  # x (query tile)
                cs((1, D)), cs((1, D)),                              # ln1 w, b
                cs((D, D)), cs((1, D)),                              # Wq, bq
                cs((D, 2 * D)), cs((1, 2 * D)),                      # Wk|Wv, bk|bv
                cs((D, D)), cs((1, D)),                              # Wo, bo
            ],
            out_specs=pl.BlockSpec((1, tq, D), lambda b, qt: (b, qt, 0)),
            scratch_shapes=[
                pltpu.VMEM((n_head, S, dh), jnp.bfloat16),           # K head-major
                pltpu.VMEM((n_head, S, dh), jnp.bfloat16),           # V head-major
            ],
        ),
        compiler_params=cp1,
    )
    y = stage1(x, x, p["ln1_w"], p["ln1_b"], wq, p["bq"], wkv, bkv, wo, p["bo"])

    # ---- Stage 2: LN2 + MLP + residual, token-wise over flattened rows ------
    rows = B * S
    row_target = 1024 if vmem_limit >= 72 * 1024 * 1024 else 512
    tr = _pick_row_tile(rows, row_target)
    y2 = y.reshape(rows, D)

    stage2 = pl.pallas_call(
        functools.partial(_mlp_residual_kernel, eps=eps),
        out_shape=jax.ShapeDtypeStruct((rows, D), x.dtype),
        grid_spec=pltpu.PrefetchScalarGridSpec(
            num_scalar_prefetch=0,
            grid=(pl.cdiv(rows, tr),),
            in_specs=[
                pl.BlockSpec((tr, D), lambda r: (r, 0)),             # token rows
                cs((1, D)), cs((1, D)),                              # ln2 w, b
                cs((D, 4 * D)), cs((1, 4 * D)),                      # W1, b1
                cs((4 * D, D)), cs((1, D)),                          # W2, b2
            ],
            out_specs=pl.BlockSpec((tr, D), lambda r: (r, 0)),
        ),
        compiler_params=cp2,
    )
    out = stage2(y2, p["ln2_w"], p["ln2_b"], w1, p["b1"], w2, p["b2"])
    return out.reshape(B, S, D)


def residual_attention_block_forward(x, params, *, n_head: int, eps: float = _LN_EPS):
    """x: [B, S, D] float32. Eval-mode forward of ResidualAttentionBlock."""
    try:
        out = _forward(x, params, n_head=n_head, eps=eps, aggressive=True)
        return jax.block_until_ready(out)
    except Exception:
        # Fallback: this jax build rejected pl.Buffered(1) / the vmem override.
        out = _forward(x, params, n_head=n_head, eps=eps, aggressive=False)
        return jax.block_until_ready(out)


# ----------------------------------------------------------------------------
# Pure-JAX f32 reference (standard MHA formulation)
# ----------------------------------------------------------------------------
def reference_forward(x, p, *, n_head: int, eps: float = _LN_EPS):
    B, S, D = x.shape
    dh = D // n_head

    def ln(z, w, b):
        mu = jnp.mean(z, -1, keepdims=True)
        var = jnp.mean((z - mu) ** 2, -1, keepdims=True)
        return (z - mu) * jax.lax.rsqrt(var + eps) * w + b

    xn = ln(x, p["ln1_w"][0], p["ln1_b"][0])
    q = xn @ p["wq"] + p["bq"][0]
    k = xn @ p["wk"] + p["bk"][0]
    v = xn @ p["wv"] + p["bv"][0]
    q = q.reshape(B, S, n_head, dh).transpose(0, 2, 1, 3)
    k = k.reshape(B, S, n_head, dh).transpose(0, 2, 1, 3)
    v = v.reshape(B, S, n_head, dh).transpose(0, 2, 1, 3)
    s = jnp.einsum("bhqd,bhkd->bhqk", q, k) / math.sqrt(dh)
    pw = jax.nn.softmax(s, axis=-1)
    ctx = jnp.einsum("bhqk,bhkd->bhqd", pw, v).transpose(0, 2, 1, 3).reshape(B, S, D)
    y = x + (ctx @ p["wo"] + p["bo"][0])

    yn = ln(y, p["ln2_w"][0], p["ln2_b"][0])
    h = yn @ p["w1"] + p["b1"][0]
    h = 0.5 * h * (1.0 + jax.lax.erf(h / math.sqrt(2.0)))
    return y + (h @ p["w2"] + p["b2"][0])


# ----------------------------------------------------------------------------
# Main (small harness shapes; production tuning should use D>=512, S>=512)
# ----------------------------------------------------------------------------
if __name__ == "__main__":
    B, S, D, H = 2, 8, 32, 4   # batch=2, seq=8, n_state=32, n_head=4

    keys = jax.random.split(jax.random.PRNGKey(0), 17)

    def lin(k, fan_in, shape):
        return jax.random.normal(k, shape, jnp.float32) / math.sqrt(fan_in)

    params = {
        "ln1_w": 1.0 + 0.1 * jax.random.normal(keys[0], (1, D), jnp.float32),
        "ln1_b": 0.1 * jax.random.normal(keys[1], (1, D), jnp.float32),
        "wq": lin(keys[2], D, (D, D)),
        "wk": lin(keys[3], D, (D, D)),
        "wv": lin(keys[4], D, (D, D)),
        "bq": 0.1 * jax.random.normal(keys[5], (1, D), jnp.float32),
        "bk": 0.1 * jax.random.normal(keys[6], (1, D), jnp.float32),
        "bv": 0.1 * jax.random.normal(keys[7], (1, D), jnp.float32),
        "wo": lin(keys[8], D, (D, D)),
        "bo": 0.1 * jax.random.normal(keys[9], (1, D), jnp.float32),
        "ln2_w": 1.0 + 0.1 * jax.random.normal(keys[10], (1, D), jnp.float32),
        "ln2_b": 0.1 * jax.random.normal(keys[11], (1, D), jnp.float32),
        "w1": lin(keys[12], D, (D, 4 * D)),
        "b1": 0.1 * jax.random.normal(keys[13], (1, 4 * D), jnp.float32),
        "w2": lin(keys[14], 4 * D, (4 * D, D)),
        "b2": 0.1 * jax.random.normal(keys[15], (1, D), jnp.float32),
    }
    x = jax.random.normal(keys[16], (B, S, D), jnp.float32)

    out = residual_attention_block_forward(x, params, n_head=H)
    out = jax.block_until_ready(out)
    assert out.shape == (B, S, D)

    ref = reference_forward(x, params, n_head=H)
    max_err = float(jnp.max(jnp.abs(out - ref)))
    # bf16 matmul inputs -> looser tolerance than a pure-f32 kernel
    assert jnp.allclose(out, ref, atol=5e-2, rtol=5e-2), f"mismatch vs reference: {max_err}"

    print("KERNEL_OK")
</pallas_src>

<mosaic_0001>
module attributes {stable_mosaic.version = 11 : i64} {
  func.func @_attn_residual_kernel(%arg0: i32, %arg1: i32, %arg2: memref<1x8x32xf32, #tpu.memory_space<vmem>>, %arg3: memref<1x8x32xf32, #tpu.memory_space<vmem>>, %arg4: memref<1x32xf32, #tpu.memory_space<vmem>>, %arg5: memref<1x32xf32, #tpu.memory_space<vmem>>, %arg6: memref<32x32xbf16, #tpu.memory_space<vmem>>, %arg7: memref<1x32xf32, #tpu.memory_space<vmem>>, %arg8: memref<32x64xbf16, #tpu.memory_space<vmem>>, %arg9: memref<1x64xf32, #tpu.memory_space<vmem>>, %arg10: memref<32x32xbf16, #tpu.memory_space<vmem>>, %arg11: memref<1x32xf32, #tpu.memory_space<vmem>>, %arg12: memref<1x8x32xf32, #tpu.memory_space<vmem>>, %arg13: memref<4x8x8xbf16, #tpu.memory_space<vmem>>, %arg14: memref<4x8x8xbf16, #tpu.memory_space<vmem>>) attributes {dimension_semantics = [#tpu.dimension_semantics<parallel>, #tpu.dimension_semantics<arbitrary>], iteration_bounds = array<i64: 2, 1>, scalar_prefetch = 0 : i64, scratch_operands = 2 : i64, tpu.core_type = #tpu.core_type<tc>, window_params = [{transform_indices = @transform_0, window_bounds = array<i64: 1, 8, 32>}, {transform_indices = @transform_1, window_bounds = array<i64: 1, 8, 32>}, {pipeline_mode = #tpu.pipeline_mode<synchronous>, transform_indices = @transform_2, window_bounds = array<i64: 1, 32>}, {pipeline_mode = #tpu.pipeline_mode<synchronous>, transform_indices = @transform_3, window_bounds = array<i64: 1, 32>}, {pipeline_mode = #tpu.pipeline_mode<synchronous>, transform_indices = @transform_4, window_bounds = array<i64: 32, 32>}, {pipeline_mode = #tpu.pipeline_mode<synchronous>, transform_indices = @transform_5, window_bounds = array<i64: 1, 32>}, {pipeline_mode = #tpu.pipeline_mode<synchronous>, transform_indices = @transform_6, window_bounds = array<i64: 32, 64>}, {pipeline_mode = #tpu.pipeline_mode<synchronous>, transform_indices = @transform_7, window_bounds = array<i64: 1, 64>}, {pipeline_mode = #tpu.pipeline_mode<synchronous>, transform_indices = @transform_8, window_bounds = array<i64: 32, 32>}, {pipeline_mode = #tpu.pipeline_mode<synchronous>, transform_indices = @transform_9, window_bounds = array<i64: 1, 32>}, {transform_indices = @transform_10, window_bounds = array<i64: 1, 8, 32>}]} {
    %c0_i32 = arith.constant 0 : i32
    %0 = arith.cmpi eq, %arg1, %c0_i32 : i32
    %1 = arith.extui %0 : i1 to i32
    %c0_i32_0 = arith.constant 0 : i32
    %2 = arith.cmpi ne, %1, %c0_i32_0 : i32
    scf.if %2 {
      %c0_35 = arith.constant 0 : index
      %c0_36 = arith.constant 0 : index
      %c0_37 = arith.constant 0 : index
      %87 = vector.load %arg2[%c0_35, %c0_36, %c0_37] : memref<1x8x32xf32, #tpu.memory_space<vmem>>, vector<1x8x32xf32>
      %88 = vector.shape_cast %87 : vector<1x8x32xf32> to vector<8x32xf32>
      %cst_38 = arith.constant dense<0.000000e+00> : vector<8xf32>
      %89 = vector.multi_reduction <add>, %88, %cst_38 [1] : vector<8x32xf32> to vector<8xf32>
      %90 = vector.shape_cast %89 : vector<8xf32> to vector<8x1xf32>
      %cst_39 = arith.constant 3.200000e+01 : f32
      %91 = vector.broadcast %cst_39 : f32 to vector<8x1xf32>
      %92 = arith.divf %90, %91 : vector<8x1xf32>
      %93 = vector.broadcast %92 : vector<8x1xf32> to vector<8x32xf32>
      %94 = arith.subf %88, %93 : vector<8x32xf32>
      %95 = arith.mulf %94, %94 : vector<8x32xf32>
      %cst_40 = arith.constant dense<0.000000e+00> : vector<8xf32>
      %96 = vector.multi_reduction <add>, %95, %cst_40 [1] : vector<8x32xf32> to vector<8xf32>
      %97 = vector.shape_cast %96 : vector<8xf32> to vector<8x1xf32>
      %cst_41 = arith.constant 3.200000e+01 : f32
      %98 = vector.broadcast %cst_41 : f32 to vector<8x1xf32>
      %99 = arith.divf %97, %98 : vector<8x1xf32>
      %cst_42 = arith.constant 9.99999974E-6 : f32
      %100 = vector.broadcast %cst_42 : f32 to vector<8x1xf32>
      %101 = arith.addf %99, %100 : vector<8x1xf32>
      %102 = math.rsqrt %101 : vector<8x1xf32>
      %103 = vector.broadcast %102 : vector<8x1xf32> to vector<8x32xf32>
      %104 = arith.mulf %94, %103 : vector<8x32xf32>
      %c0_43 = arith.constant 0 : index
      %c0_44 = arith.constant 0 : index
      %105 = vector.load %arg4[%c0_43, %c0_44] : memref<1x32xf32, #tpu.memory_space<vmem>>, vector<1x32xf32>
      %106 = vector.shape_cast %105 : vector<1x32xf32> to vector<32xf32>
      %107 = vector.shape_cast %106 : vector<32xf32> to vector<1x32xf32>
      %108 = vector.broadcast %107 : vector<1x32xf32> to vector<8x32xf32>
      %109 = arith.mulf %104, %108 : vector<8x32xf32>
      %c0_45 = arith.constant 0 : index
      %c0_46 = arith.constant 0 : index
      %110 = vector.load %arg5[%c0_45, %c0_46] : memref<1x32xf32, #tpu.memory_space<vmem>>, vector<1x32xf32>
      %111 = vector.shape_cast %110 : vector<1x32xf32> to vector<32xf32>
      %112 = vector.shape_cast %111 : vector<32xf32> to vector<1x32xf32>
      %113 = vector.broadcast %112 : vector<1x32xf32> to vector<8x32xf32>
      %114 = arith.addf %109, %113 : vector<8x32xf32>
      %115 = arith.truncf %114 : vector<8x32xf32> to vector<8x32xbf16>
      %c0_47 = arith.constant 0 : index
      %c0_48 = arith.constant 0 : index
      %116 = vector.load %arg8[%c0_47, %c0_48] : memref<32x64xbf16, #tpu.memory_space<vmem>>, vector<32x64xbf16>
      %cst_49 = arith.constant dense<0.000000e+00> : vector<8x64xf32>
      %117 = tpu.matmul %115, %116, %cst_49 {dimension_numbers = #tpu.dot_dimension_numbers<[1], [0], [0], [1], [0, 0, 1, 1], [], []>} : vector<8x32xbf16>, vector<32x64xbf16>, vector<8x64xf32> -> vector<8x64xf32>
      %c0_50 = arith.constant 0 : index
      %c0_51 = arith.constant 0 : index
      %118 = vector.load %arg9[%c0_50, %c0_51] : memref<1x64xf32, #tpu.memory_space<vmem>>, vector<1x64xf32>
      %119 = vector.shape_cast %118 : vector<1x64xf32> to vector<64xf32>
      %120 = vector.shape_cast %119 : vector<64xf32> to vector<1x64xf32>
      %121 = vector.broadcast %120 : vector<1x64xf32> to vector<8x64xf32>
      %122 = arith.addf %117, %121 : vector<8x64xf32>
      %123 = vector.extract_strided_slice %122 {offsets = [0, 0], sizes = [8, 8], strides = [1, 1]} : vector<8x64xf32> to vector<8x8xf32>
      %124 = vector.extract_strided_slice %122 {offsets = [0, 8], sizes = [8, 8], strides = [1, 1]} : vector<8x64xf32> to vector<8x8xf32>
      %125 = vector.extract_strided_slice %122 {offsets = [0, 16], sizes = [8, 8], strides = [1, 1]} : vector<8x64xf32> to vector<8x8xf32>
      %126 = vector.extract_strided_slice %122 {offsets = [0, 24], sizes = [8, 8], strides = [1, 1]} : vector<8x64xf32> to vector<8x8xf32>
      %127 = vector.shape_cast %123 : vector<8x8xf32> to vector<1x8x8xf32>
      %128 = vector.shape_cast %124 : vector<8x8xf32> to vector<1x8x8xf32>
      %129 = vector.shape_cast %125 : vector<8x8xf32> to vector<1x8x8xf32>
      %130 = vector.shape_cast %126 : vector<8x8xf32> to vector<1x8x8xf32>
      %131 = tpu.concatenate %127, %128, %129, %130 in 0 : vector<1x8x8xf32>, vector<1x8x8xf32>, vector<1x8x8xf32>, vector<1x8x8xf32> -> vector<4x8x8xf32>
      %132 = arith.truncf %131 : vector<4x8x8xf32> to vector<4x8x8xbf16>
      %c0_52 = arith.constant 0 : index
      %c0_53 = arith.constant 0 : index
      %c0_54 = arith.constant 0 : index
      %133 = vector.load %arg13[%c0_52, %c0_53, %c0_54] : memref<4x8x8xbf16, #tpu.memory_space<vmem>>, vector<4x8x8xbf16>
      tpu.vector_store %arg13[%c0_52, %c0_53, %c0_54], %132 {strides = array<i32>} : memref<4x8x8xbf16, #tpu.memory_space<vmem>>, vector<4x8x8xbf16>,
      %134 = vector.extract_strided_slice %122 {offsets = [0, 32], sizes = [8, 8], strides = [1, 1]} : vector<8x64xf32> to vector<8x8xf32>
      %135 = vector.extract_strided_slice %122 {offsets = [0, 40], sizes = [8, 8], strides = [1, 1]} : vector<8x64xf32> to vector<8x8xf32>
      %136 = vector.extract_strided_slice %122 {offsets = [0, 48], sizes = [8, 8], strides = [1, 1]} : vector<8x64xf32> to vector<8x8xf32>
      %137 = vector.extract_strided_slice %122 {offsets = [0, 56], sizes = [8, 8], strides = [1, 1]} : vector<8x64xf32> to vector<8x8xf32>
      %138 = vector.shape_cast %134 : vector<8x8xf32> to vector<1x8x8xf32>
      %139 = vector.shape_cast %135 : vector<8x8xf32> to vector<1x8x8xf32>
      %140 = vector.shape_cast %136 : vector<8x8xf32> to vector<1x8x8xf32>
      %141 = vector.shape_cast %137 : vector<8x8xf32> to vector<1x8x8xf32>
      %142 = tpu.concatenate %138, %139, %140, %141 in 0 : vector<1x8x8xf32>, vector<1x8x8xf32>, vector<1x8x8xf32>, vector<1x8x8xf32> -> vector<4x8x8xf32>
      %143 = arith.truncf %142 : vector<4x8x8xf32> to vector<4x8x8xbf16>
      %c0_55 = arith.constant 0 : index
      %c0_56 = arith.constant 0 : index
      %c0_57 = arith.constant 0 : index
      %144 = vector.load %arg14[%c0_55, %c0_56, %c0_57] : memref<4x8x8xbf16, #tpu.memory_space<vmem>>, vector<4x8x8xbf16>
      tpu.vector_store %arg14[%c0_55, %c0_56, %c0_57], %143 {strides = array<i32>} : memref<4x8x8xbf16, #tpu.memory_space<vmem>>, vector<4x8x8xbf16>,
    } else {
    }
    %c0 = arith.constant 0 : index
    %c0_1 = arith.constant 0 : index
    %c0_2 = arith.constant 0 : index
    %3 = vector.load %arg3[%c0, %c0_1, %c0_2] : memref<1x8x32xf32, #tpu.memory_space<vmem>>, vector<1x8x32xf32>
    %4 = vector.shape_cast %3 : vector<1x8x32xf32> to vector<8x32xf32>
    %cst = arith.constant dense<0.000000e+00> : vector<8xf32>
    %5 = vector.multi_reduction <add>, %4, %cst [1] : vector<8x32xf32> to vector<8xf32>
    %6 = vector.shape_cast %5 : vector<8xf32> to vector<8x1xf32>
    %cst_3 = arith.constant 3.200000e+01 : f32
    %7 = vector.broadcast %cst_3 : f32 to vector<8x1xf32>
    %8 = arith.divf %6, %7 : vector<8x1xf32>
    %9 = vector.broadcast %8 : vector<8x1xf32> to vector<8x32xf32>
    %10 = arith.subf %4, %9 : vector<8x32xf32>
    %11 = arith.mulf %10, %10 : vector<8x32xf32>
    %cst_4 = arith.constant dense<0.000000e+00> : vector<8xf32>
    %12 = vector.multi_reduction <add>, %11, %cst_4 [1] : vector<8x32xf32> to vector<8xf32>
    %13 = vector.shape_cast %12 : vector<8xf32> to vector<8x1xf32>
    %cst_5 = arith.constant 3.200000e+01 : f32
    %14 = vector.broadcast %cst_5 : f32 to vector<8x1xf32>
    %15 = arith.divf %13, %14 : vector<8x1xf32>
    %cst_6 = arith.constant 9.99999974E-6 : f32
    %16 = vector.broadcast %cst_6 : f32 to vector<8x1xf32>
    %17 = arith.addf %15, %16 : vector<8x1xf32>
    %18 = math.rsqrt %17 : vector<8x1xf32>
    %19 = vector.broadcast %18 : vector<8x1xf32> to vector<8x32xf32>
    %20 = arith.mulf %10, %19 : vector<8x32xf32>
    %c0_7 = arith.constant 0 : index
    %c0_8 = arith.constant 0 : index
    %21 = vector.load %arg4[%c0_7, %c0_8] : memref<1x32xf32, #tpu.memory_space<vmem>>, vector<1x32xf32>
    %22 = vector.shape_cast %21 : vector<1x32xf32> to vector<32xf32>
    %23 = vector.shape_cast %22 : vector<32xf32> to vector<1x32xf32>
    %24 = vector.broadcast %23 : vector<1x32xf32> to vector<8x32xf32>
    %25 = arith.mulf %20, %24 : vector<8x32xf32>
    %c0_9 = arith.constant 0 : index
    %c0_10 = arith.constant 0 : index
    %26 = vector.load %arg5[%c0_9, %c0_10] : memref<1x32xf32, #tpu.memory_space<vmem>>, vector<1x32xf32>
    %27 = vector.shape_cast %26 : vector<1x32xf32> to vector<32xf32>
    %28 = vector.shape_cast %27 : vector<32xf32> to vector<1x32xf32>
    %29 = vector.broadcast %28 : vector<1x32xf32> to vector<8x32xf32>
    %30 = arith.addf %25, %29 : vector<8x32xf32>
    %31 = arith.truncf %30 : vector<8x32xf32> to vector<8x32xbf16>
    %c0_11 = arith.constant 0 : index
    %c0_12 = arith.constant 0 : index
    %32 = vector.load %arg6[%c0_11, %c0_12] : memref<32x32xbf16, #tpu.memory_space<vmem>>, vector<32x32xbf16>
    %cst_13 = arith.constant dense<0.000000e+00> : vector<8x32xf32>
    %33 = tpu.matmul %31, %32, %cst_13 {dimension_numbers = #tpu.dot_dimension_numbers<[1], [0], [0], [1], [0, 0, 1, 1], [], []>} : vector<8x32xbf16>, vector<32x32xbf16>, vector<8x32xf32> -> vector<8x32xf32>
    %c0_14 = arith.constant 0 : index
    %c0_15 = arith.constant 0 : index
    %34 = vector.load %arg7[%c0_14, %c0_15] : memref<1x32xf32, #tpu.memory_space<vmem>>, vector<1x32xf32>
    %35 = vector.shape_cast %34 : vector<1x32xf32> to vector<32xf32>
    %36 = vector.shape_cast %35 : vector<32xf32> to vector<1x32xf32>
    %37 = vector.broadcast %36 : vector<1x32xf32> to vector<8x32xf32>
    %38 = arith.addf %33, %37 : vector<8x32xf32>
    %39 = vector.extract_strided_slice %38 {offsets = [0, 0], sizes = [8, 8], strides = [1, 1]} : vector<8x32xf32> to vector<8x8xf32>
    %40 = vector.extract_strided_slice %38 {offsets = [0, 8], sizes = [8, 8], strides = [1, 1]} : vector<8x32xf32> to vector<8x8xf32>
    %41 = vector.extract_strided_slice %38 {offsets = [0, 16], sizes = [8, 8], strides = [1, 1]} : vector<8x32xf32> to vector<8x8xf32>
    %42 = vector.extract_strided_slice %38 {offsets = [0, 24], sizes = [8, 8], strides = [1, 1]} : vector<8x32xf32> to vector<8x8xf32>
    %43 = vector.shape_cast %39 : vector<8x8xf32> to vector<1x8x8xf32>
    %44 = vector.shape_cast %40 : vector<8x8xf32> to vector<1x8x8xf32>
    %45 = vector.shape_cast %41 : vector<8x8xf32> to vector<1x8x8xf32>
    %46 = vector.shape_cast %42 : vector<8x8xf32> to vector<1x8x8xf32>
    %47 = tpu.concatenate %43, %44, %45, %46 in 0 : vector<1x8x8xf32>, vector<1x8x8xf32>, vector<1x8x8xf32>, vector<1x8x8xf32> -> vector<4x8x8xf32>
    %48 = arith.truncf %47 : vector<4x8x8xf32> to vector<4x8x8xbf16>
    %c0_16 = arith.constant 0 : index
    %c0_17 = arith.constant 0 : index
    %c0_18 = arith.constant 0 : index
    %49 = vector.load %arg13[%c0_16, %c0_17, %c0_18] : memref<4x8x8xbf16, #tpu.memory_space<vmem>>, vector<4x8x8xbf16>
    "tpu.trace_start"() <{level = 10 : i32, message = "hqd,hkd->hqk"}> : () -> ()
    %cst_19 = arith.constant dense<0.000000e+00> : vector<4x8x8xf32>
    %50 = tpu.matmul %48, %49, %cst_19 {dimension_numbers = #tpu.dot_dimension_numbers<[2], [2], [1], [1], [0, 0, 0, 1, 1, 1], [0], [0]>} : vector<4x8x8xbf16>, vector<4x8x8xbf16>, vector<4x8x8xf32> -> vector<4x8x8xf32>
    "tpu.trace_stop"() : () -> ()
    %cst_20 = arith.constant 0.353553385 : f32
    %51 = vector.broadcast %cst_20 : f32 to vector<4x8x8xf32>
    %52 = arith.mulf %50, %51 : vector<4x8x8xf32>
    %cst_21 = arith.constant dense<0xFF800000> : vector<4x8xf32>
    %53 = vector.multi_reduction <maximumf>, %52, %cst_21 [2] : vector<4x8x8xf32> to vector<4x8xf32>
    %54 = vector.shape_cast %53 : vector<4x8xf32> to vector<4x8x1xf32>
    %55 = vector.broadcast %54 : vector<4x8x1xf32> to vector<4x8x8xf32>
    %56 = arith.subf %52, %55 : vector<4x8x8xf32>
    %57 = math.exp %56 : vector<4x8x8xf32>
    %cst_22 = arith.constant dense<0.000000e+00> : vector<4x8xf32>
    %58 = vector.multi_reduction <add>, %57, %cst_22 [2] : vector<4x8x8xf32> to vector<4x8xf32>
    %59 = vector.shape_cast %58 : vector<4x8xf32> to vector<4x8x1xf32>
    %60 = tpu.reciprocal %59 {approx = true} : vector<4x8x1xf32> -> vector<4x8x1xf32>
    %61 = arith.truncf %57 : vector<4x8x8xf32> to vector<4x8x8xbf16>
    %c0_23 = arith.constant 0 : index
    %c0_24 = arith.constant 0 : index
    %c0_25 = arith.constant 0 : index
    %62 = vector.load %arg14[%c0_23, %c0_24, %c0_25] : memref<4x8x8xbf16, #tpu.memory_space<vmem>>, vector<4x8x8xbf16>
    "tpu.trace_start"() <{level = 10 : i32, message = "hqk,hkd->hqd"}> : () -> ()
    %cst_26 = arith.constant dense<0.000000e+00> : vector<4x8x8xf32>
    %63 = tpu.matmul %61, %62, %cst_26 {dimension_numbers = #tpu.dot_dimension_numbers<[2], [1], [1], [2], [0, 0, 0, 1, 1, 2], [0], [0]>} : vector<4x8x8xbf16>, vector<4x8x8xbf16>, vector<4x8x8xf32> -> vector<4x8x8xf32>
    "tpu.trace_stop"() : () -> ()
    %64 = vector.broadcast %60 : vector<4x8x1xf32> to vector<4x8x8xf32>
    %65 = arith.mulf %63, %64 : vector<4x8x8xf32>
    %66 = vector.extract_strided_slice %65 {offsets = [0, 0, 0], sizes = [1, 8, 8], strides = [1, 1, 1]} : vector<4x8x8xf32> to vector<1x8x8xf32>
    %67 = vector.shape_cast %66 : vector<1x8x8xf32> to vector<8x8xf32>
    %68 = vector.extract_strided_slice %65 {offsets = [1, 0, 0], sizes = [1, 8, 8], strides = [1, 1, 1]} : vector<4x8x8xf32> to vector<1x8x8xf32>
    %69 = vector.shape_cast %68 : vector<1x8x8xf32> to vector<8x8xf32>
    %70 = vector.extract_strided_slice %65 {offsets = [2, 0, 0], sizes = [1, 8, 8], strides = [1, 1, 1]} : vector<4x8x8xf32> to vector<1x8x8xf32>
    %71 = vector.shape_cast %70 : vector<1x8x8xf32> to vector<8x8xf32>
    %72 = vector.extract_strided_slice %65 {offsets = [3, 0, 0], sizes = [1, 8, 8], strides = [1, 1, 1]} : vector<4x8x8xf32> to vector<1x8x8xf32>
    %73 = vector.shape_cast %72 : vector<1x8x8xf32> to vector<8x8xf32>
    %74 = tpu.concatenate %67, %69, %71, %73 in 1 : vector<8x8xf32>, vector<8x8xf32>, vector<8x8xf32>, vector<8x8xf32> -> vector<8x32xf32>
    %75 = arith.truncf %74 : vector<8x32xf32> to vector<8x32xbf16>
    %c0_27 = arith.constant 0 : index
    %c0_28 = arith.constant 0 : index
    %76 = vector.load %arg10[%c0_27, %c0_28] : memref<32x32xbf16, #tpu.memory_space<vmem>>, vector<32x32xbf16>
    %cst_29 = arith.constant dense<0.000000e+00> : vector<8x32xf32>
    %77 = tpu.matmul %75, %76, %cst_29 {dimension_numbers = #tpu.dot_dimension_numbers<[1], [0], [0], [1], [0, 0, 1, 1], [], []>} : vector<8x32xbf16>, vector<32x32xbf16>, vector<8x32xf32> -> vector<8x32xf32>
    %c0_30 = arith.constant 0 : index
    %c0_31 = arith.constant 0 : index
    %78 = vector.load %arg11[%c0_30, %c0_31] : memref<1x32xf32, #tpu.memory_space<vmem>>, vector<1x32xf32>
    %79 = vector.shape_cast %78 : vector<1x32xf32> to vector<32xf32>
    %80 = vector.shape_cast %79 : vector<32xf32> to vector<1x32xf32>
    %81 = vector.broadcast %80 : vector<1x32xf32> to vector<8x32xf32>
    %82 = arith.addf %77, %81 : vector<8x32xf32>
    %83 = arith.addf %4, %82 : vector<8x32xf32>
    %c0_32 = arith.constant 0 : index
    %c0_33 = arith.constant 0 : index
    %c0_34 = arith.constant 0 : index
    %84 = vector.load %arg12[%c0_32, %c0_33, %c0_34] : memref<1x8x32xf32, #tpu.memory_space<vmem>>, vector<1x8x32xf32>
    %85 = vector.shape_cast %84 : vector<1x8x32xf32> to vector<8x32xf32>
    %86 = vector.shape_cast %83 : vector<8x32xf32> to vector<1x8x32xf32>
    tpu.vector_store %arg12[%c0_32, %c0_33, %c0_34], %86 {strides = array<i32>} : memref<1x8x32xf32, #tpu.memory_space<vmem>>, vector<1x8x32xf32>,
    return
  }
  func.func @transform_0(%arg0: i32, %arg1: i32) -> (i32, i32, i32) {
    %c0_i32 = arith.constant 0 : i32
    %c0_i32_0 = arith.constant 0 : i32
    %c0_i32_1 = arith.constant 0 : i32
    return %arg0, %c0_i32, %c0_i32_0 : i32, i32, i32
  }
  func.func @transform_1(%arg0: i32, %arg1: i32) -> (i32, i32, i32) {
    %c0_i32 = arith.constant 0 : i32
    %c0_i32_0 = arith.constant 0 : i32
    return %arg0, %arg1, %c0_i32 : i32, i32, i32
  }
  func.func @transform_2(%arg0: i32, %arg1: i32) -> (i32, i32) {
    %c0_i32 = arith.constant 0 : i32
    %c0_i32_0 = arith.constant 0 : i32
    %c0_i32_1 = arith.constant 0 : i32
    return %c0_i32, %c0_i32_0 : i32, i32
  }
  func.func @transform_3(%arg0: i32, %arg1: i32) -> (i32, i32) {
    %c0_i32 = arith.constant 0 : i32
    %c0_i32_0 = arith.constant 0 : i32
    %c0_i32_1 = arith.constant 0 : i32
    return %c0_i32, %c0_i32_0 : i32, i32
  }
  func.func @transform_4(%arg0: i32, %arg1: i32) -> (i32, i32) {
    %c0_i32 = arith.constant 0 : i32
    %c0_i32_0 = arith.constant 0 : i32
    %c0_i32_1 = arith.constant 0 : i32
    return %c0_i32, %c0_i32_0 : i32, i32
  }
  func.func @transform_5(%arg0: i32, %arg1: i32) -> (i32, i32) {
    %c0_i32 = arith.constant 0 : i32
    %c0_i32_0 = arith.constant 0 : i32
    %c0_i32_1 = arith.constant 0 : i32
    return %c0_i32, %c0_i32_0 : i32, i32
  }
  func.func @transform_6(%arg0: i32, %arg1: i32) -> (i32, i32) {
    %c0_i32 = arith.constant 0 : i32
    %c0_i32_0 = arith.constant 0 : i32
    %c0_i32_1 = arith.constant 0 : i32
    return %c0_i32, %c0_i32_0 : i32, i32
  }
  func.func @transform_7(%arg0: i32, %arg1: i32) -> (i32, i32) {
    %c0_i32 = arith.constant 0 : i32
    %c0_i32_0 = arith.constant 0 : i32
    %c0_i32_1 = arith.constant 0 : i32
    return %c0_i32, %c0_i32_0 : i32, i32
  }
  func.func @transform_8(%arg0: i32, %arg1: i32) -> (i32, i32) {
    %c0_i32 = arith.constant 0 : i32
    %c0_i32_0 = arith.constant 0 : i32
    %c0_i32_1 = arith.constant 0 : i32
    return %c0_i32, %c0_i32_0 : i32, i32
  }
  func.func @transform_9(%arg0: i32, %arg1: i32) -> (i32, i32) {
    %c0_i32 = arith.constant 0 : i32
    %c0_i32_0 = arith.constant 0 : i32
    %c0_i32_1 = arith.constant 0 : i32
    return %c0_i32, %c0_i32_0 : i32, i32
  }
  func.func @transform_10(%arg0: i32, %arg1: i32) -> (i32, i32, i32) {
    %c0_i32 = arith.constant 0 : i32
    %c0_i32_0 = arith.constant 0 : i32
    return %arg0, %arg1, %c0_i32 : i32, i32, i32
  }
}

module attributes {stable_mosaic.version = 11 : i64} {
  func.func @_attn_residual_kernel(%arg0: i32, %arg1: i32, %arg2: memref<1x8x32xf32, #tpu.memory_space<vmem>>, %arg3: memref<1x8x32xf32, #tpu.memory_space<vmem>>, %arg4: memref<1x32xf32, #tpu.memory_space<vmem>>, %arg5: memref<1x32xf32, #tpu.memory_space<vmem>>, %arg6: memref<32x32xbf16, #tpu.memory_space<vmem>>, %arg7: memref<1x32xf32, #tpu.memory_space<vmem>>, %arg8: memref<32x64xbf16, #tpu.memory_space<vmem>>, %arg9: memref<1x64xf32, #tpu.memory_space<vmem>>, %arg10: memref<32x32xbf16, #tpu.memory_space<vmem>>, %arg11: memref<1x32xf32, #tpu.memory_space<vmem>>, %arg12: memref<1x8x32xf32, #tpu.memory_space<vmem>>, %arg13: memref<4x8x8xbf16, #tpu.memory_space<vmem>>, %arg14: memref<4x8x8xbf16, #tpu.memory_space<vmem>>) attributes {dimension_semantics = [#tpu.dimension_semantics<parallel>, #tpu.dimension_semantics<arbitrary>], iteration_bounds = array<i64: 2, 1>, scalar_prefetch = 0 : i64, scratch_operands = 2 : i64, tpu.core_type = #tpu.core_type<tc>, window_params = [{transform_indices = @transform_0, window_bounds = array<i64: 1, 8, 32>}, {transform_indices = @transform_1, window_bounds = array<i64: 1, 8, 32>}, {pipeline_mode = #tpu.pipeline_mode<synchronous>, transform_indices = @transform_2, window_bounds = array<i64: 1, 32>}, {pipeline_mode = #tpu.pipeline_mode<synchronous>, transform_indices = @transform_3, window_bounds = array<i64: 1, 32>}, {pipeline_mode = #tpu.pipeline_mode<synchronous>, transform_indices = @transform_4, window_bounds = array<i64: 32, 32>}, {pipeline_mode = #tpu.pipeline_mode<synchronous>, transform_indices = @transform_5, window_bounds = array<i64: 1, 32>}, {pipeline_mode = #tpu.pipeline_mode<synchronous>, transform_indices = @transform_6, window_bounds = array<i64: 32, 64>}, {pipeline_mode = #tpu.pipeline_mode<synchronous>, transform_indices = @transform_7, window_bounds = array<i64: 1, 64>}, {pipeline_mode = #tpu.pipeline_mode<synchronous>, transform_indices = @transform_8, window_bounds = array<i64: 32, 32>}, {pipeline_mode = #tpu.pipeline_mode<synchronous>, transform_indices = @transform_9, window_bounds = array<i64: 1, 32>}, {transform_indices = @transform_10, window_bounds = array<i64: 1, 8, 32>}]} {
    %c0_i32 = arith.constant 0 : i32
    %0 = arith.cmpi eq, %arg1, %c0_i32 : i32
    %1 = arith.extui %0 : i1 to i32
    %c0_i32_0 = arith.constant 0 : i32
    %2 = arith.cmpi ne, %1, %c0_i32_0 : i32
    scf.if %2 {
      %c0_35 = arith.constant 0 : index
      %c0_36 = arith.constant 0 : index
      %c0_37 = arith.constant 0 : index
      %87 = vector.load %arg2[%c0_35, %c0_36, %c0_37] : memref<1x8x32xf32, #tpu.memory_space<vmem>>, vector<1x8x32xf32>
      %88 = vector.shape_cast %87 : vector<1x8x32xf32> to vector<8x32xf32>
      %cst_38 = arith.constant dense<0.000000e+00> : vector<8xf32>
      %89 = vector.multi_reduction <add>, %88, %cst_38 [1] : vector<8x32xf32> to vector<8xf32>
      %90 = vector.shape_cast %89 : vector<8xf32> to vector<8x1xf32>
      %cst_39 = arith.constant 3.200000e+01 : f32
      %91 = vector.broadcast %cst_39 : f32 to vector<8x1xf32>
      %92 = arith.divf %90, %91 : vector<8x1xf32>
      %93 = vector.broadcast %92 : vector<8x1xf32> to vector<8x32xf32>
      %94 = arith.subf %88, %93 : vector<8x32xf32>
      %95 = arith.mulf %94, %94 : vector<8x32xf32>
      %cst_40 = arith.constant dense<0.000000e+00> : vector<8xf32>
      %96 = vector.multi_reduction <add>, %95, %cst_40 [1] : vector<8x32xf32> to vector<8xf32>
      %97 = vector.shape_cast %96 : vector<8xf32> to vector<8x1xf32>
      %cst_41 = arith.constant 3.200000e+01 : f32
      %98 = vector.broadcast %cst_41 : f32 to vector<8x1xf32>
      %99 = arith.divf %97, %98 : vector<8x1xf32>
      %cst_42 = arith.constant 9.99999974E-6 : f32
      %100 = vector.broadcast %cst_42 : f32 to vector<8x1xf32>
      %101 = arith.addf %99, %100 : vector<8x1xf32>
      %102 = math.rsqrt %101 : vector<8x1xf32>
      %103 = vector.broadcast %102 : vector<8x1xf32> to vector<8x32xf32>
      %104 = arith.mulf %94, %103 : vector<8x32xf32>
      %c0_43 = arith.constant 0 : index
      %c0_44 = arith.constant 0 : index
      %105 = vector.load %arg4[%c0_43, %c0_44] : memref<1x32xf32, #tpu.memory_space<vmem>>, vector<1x32xf32>
      %106 = vector.shape_cast %105 : vector<1x32xf32> to vector<32xf32>
      %107 = vector.shape_cast %106 : vector<32xf32> to vector<1x32xf32>
      %108 = vector.broadcast %107 : vector<1x32xf32> to vector<8x32xf32>
      %109 = arith.mulf %104, %108 : vector<8x32xf32>
      %c0_45 = arith.constant 0 : index
      %c0_46 = arith.constant 0 : index
      %110 = vector.load %arg5[%c0_45, %c0_46] : memref<1x32xf32, #tpu.memory_space<vmem>>, vector<1x32xf32>
      %111 = vector.shape_cast %110 : vector<1x32xf32> to vector<32xf32>
      %112 = vector.shape_cast %111 : vector<32xf32> to vector<1x32xf32>
      %113 = vector.broadcast %112 : vector<1x32xf32> to vector<8x32xf32>
      %114 = arith.addf %109, %113 : vector<8x32xf32>
      %115 = arith.truncf %114 : vector<8x32xf32> to vector<8x32xbf16>
      %c0_47 = arith.constant 0 : index
      %c0_48 = arith.constant 0 : index
      %116 = vector.load %arg8[%c0_47, %c0_48] : memref<32x64xbf16, #tpu.memory_space<vmem>>, vector<32x64xbf16>
      %cst_49 = arith.constant dense<0.000000e+00> : vector<8x64xf32>
      %117 = tpu.matmul %115, %116, %cst_49 {dimension_numbers = #tpu.dot_dimension_numbers<[1], [0], [0], [1], [0, 0, 1, 1], [], []>} : vector<8x32xbf16>, vector<32x64xbf16>, vector<8x64xf32> -> vector<8x64xf32>
      %c0_50 = arith.constant 0 : index
      %c0_51 = arith.constant 0 : index
      %118 = vector.load %arg9[%c0_50, %c0_51] : memref<1x64xf32, #tpu.memory_space<vmem>>, vector<1x64xf32>
      %119 = vector.shape_cast %118 : vector<1x64xf32> to vector<64xf32>
      %120 = vector.shape_cast %119 : vector<64xf32> to vector<1x64xf32>
      %121 = vector.broadcast %120 : vector<1x64xf32> to vector<8x64xf32>
      %122 = arith.addf %117, %121 : vector<8x64xf32>
      %123 = vector.extract_strided_slice %122 {offsets = [0, 0], sizes = [8, 8], strides = [1, 1]} : vector<8x64xf32> to vector<8x8xf32>
      %124 = vector.extract_strided_slice %122 {offsets = [0, 8], sizes = [8, 8], strides = [1, 1]} : vector<8x64xf32> to vector<8x8xf32>
      %125 = vector.extract_strided_slice %122 {offsets = [0, 16], sizes = [8, 8], strides = [1, 1]} : vector<8x64xf32> to vector<8x8xf32>
      %126 = vector.extract_strided_slice %122 {offsets = [0, 24], sizes = [8, 8], strides = [1, 1]} : vector<8x64xf32> to vector<8x8xf32>
      %127 = vector.shape_cast %123 : vector<8x8xf32> to vector<1x8x8xf32>
      %128 = vector.shape_cast %124 : vector<8x8xf32> to vector<1x8x8xf32>
      %129 = vector.shape_cast %125 : vector<8x8xf32> to vector<1x8x8xf32>
      %130 = vector.shape_cast %126 : vector<8x8xf32> to vector<1x8x8xf32>
      %131 = tpu.concatenate %127, %128, %129, %130 in 0 : vector<1x8x8xf32>, vector<1x8x8xf32>, vector<1x8x8xf32>, vector<1x8x8xf32> -> vector<4x8x8xf32>
      %132 = arith.truncf %131 : vector<4x8x8xf32> to vector<4x8x8xbf16>
      %c0_52 = arith.constant 0 : index
      %c0_53 = arith.constant 0 : index
      %c0_54 = arith.constant 0 : index
      %133 = vector.load %arg13[%c0_52, %c0_53, %c0_54] : memref<4x8x8xbf16, #tpu.memory_space<vmem>>, vector<4x8x8xbf16>
      tpu.vector_store %arg13[%c0_52, %c0_53, %c0_54], %132 {strides = array<i32>} : memref<4x8x8xbf16, #tpu.memory_space<vmem>>, vector<4x8x8xbf16>,
      %134 = vector.extract_strided_slice %122 {offsets = [0, 32], sizes = [8, 8], strides = [1, 1]} : vector<8x64xf32> to vector<8x8xf32>
      %135 = vector.extract_strided_slice %122 {offsets = [0, 40], sizes = [8, 8], strides = [1, 1]} : vector<8x64xf32> to vector<8x8xf32>
      %136 = vector.extract_strided_slice %122 {offsets = [0, 48], sizes = [8, 8], strides = [1, 1]} : vector<8x64xf32> to vector<8x8xf32>
      %137 = vector.extract_strided_slice %122 {offsets = [0, 56], sizes = [8, 8], strides = [1, 1]} : vector<8x64xf32> to vector<8x8xf32>
      %138 = vector.shape_cast %134 : vector<8x8xf32> to vector<1x8x8xf32>
      %139 = vector.shape_cast %135 : vector<8x8xf32> to vector<1x8x8xf32>
      %140 = vector.shape_cast %136 : vector<8x8xf32> to vector<1x8x8xf32>
      %141 = vector.shape_cast %137 : vector<8x8xf32> to vector<1x8x8xf32>
      %142 = tpu.concatenate %138, %139, %140, %141 in 0 : vector<1x8x8xf32>, vector<1x8x8xf32>, vector<1x8x8xf32>, vector<1x8x8xf32> -> vector<4x8x8xf32>
      %143 = arith.truncf %142 : vector<4x8x8xf32> to vector<4x8x8xbf16>
      %c0_55 = arith.constant 0 : index
      %c0_56 = arith.constant 0 : index
      %c0_57 = arith.constant 0 : index
      %144 = vector.load %arg14[%c0_55, %c0_56, %c0_57] : memref<4x8x8xbf16, #tpu.memory_space<vmem>>, vector<4x8x8xbf16>
      tpu.vector_store %arg14[%c0_55, %c0_56, %c0_57], %143 {strides = array<i32>} : memref<4x8x8xbf16, #tpu.memory_space<vmem>>, vector<4x8x8xbf16>,
    } else {
    }
    %c0 = arith.constant 0 : index
    %c0_1 = arith.constant 0 : index
    %c0_2 = arith.constant 0 : index
    %3 = vector.load %arg3[%c0, %c0_1, %c0_2] : memref<1x8x32xf32, #tpu.memory_space<vmem>>, vector<1x8x32xf32>
    %4 = vector.shape_cast %3 : vector<1x8x32xf32> to vector<8x32xf32>
    %cst = arith.constant dense<0.000000e+00> : vector<8xf32>
    %5 = vector.multi_reduction <add>, %4, %cst [1] : vector<8x32xf32> to vector<8xf32>
    %6 = vector.shape_cast %5 : vector<8xf32> to vector<8x1xf32>
    %cst_3 = arith.constant 3.200000e+01 : f32
    %7 = vector.broadcast %cst_3 : f32 to vector<8x1xf32>
    %8 = arith.divf %6, %7 : vector<8x1xf32>
    %9 = vector.broadcast %8 : vector<8x1xf32> to vector<8x32xf32>
    %10 = arith.subf %4, %9 : vector<8x32xf32>
    %11 = arith.mulf %10, %10 : vector<8x32xf32>
    %cst_4 = arith.constant dense<0.000000e+00> : vector<8xf32>
    %12 = vector.multi_reduction <add>, %11, %cst_4 [1] : vector<8x32xf32> to vector<8xf32>
    %13 = vector.shape_cast %12 : vector<8xf32> to vector<8x1xf32>
    %cst_5 = arith.constant 3.200000e+01 : f32
    %14 = vector.broadcast %cst_5 : f32 to vector<8x1xf32>
    %15 = arith.divf %13, %14 : vector<8x1xf32>
    %cst_6 = arith.constant 9.99999974E-6 : f32
    %16 = vector.broadcast %cst_6 : f32 to vector<8x1xf32>
    %17 = arith.addf %15, %16 : vector<8x1xf32>
    %18 = math.rsqrt %17 : vector<8x1xf32>
    %19 = vector.broadcast %18 : vector<8x1xf32> to vector<8x32xf32>
    %20 = arith.mulf %10, %19 : vector<8x32xf32>
    %c0_7 = arith.constant 0 : index
    %c0_8 = arith.constant 0 : index
    %21 = vector.load %arg4[%c0_7, %c0_8] : memref<1x32xf32, #tpu.memory_space<vmem>>, vector<1x32xf32>
    %22 = vector.shape_cast %21 : vector<1x32xf32> to vector<32xf32>
    %23 = vector.shape_cast %22 : vector<32xf32> to vector<1x32xf32>
    %24 = vector.broadcast %23 : vector<1x32xf32> to vector<8x32xf32>
    %25 = arith.mulf %20, %24 : vector<8x32xf32>
    %c0_9 = arith.constant 0 : index
    %c0_10 = arith.constant 0 : index
    %26 = vector.load %arg5[%c0_9, %c0_10] : memref<1x32xf32, #tpu.memory_space<vmem>>, vector<1x32xf32>
    %27 = vector.shape_cast %26 : vector<1x32xf32> to vector<32xf32>
    %28 = vector.shape_cast %27 : vector<32xf32> to vector<1x32xf32>
    %29 = vector.broadcast %28 : vector<1x32xf32> to vector<8x32xf32>
    %30 = arith.addf %25, %29 : vector<8x32xf32>
    %31 = arith.truncf %30 : vector<8x32xf32> to vector<8x32xbf16>
    %c0_11 = arith.constant 0 : index
    %c0_12 = arith.constant 0 : index
    %32 = vector.load %arg6[%c0_11, %c0_12] : memref<32x32xbf16, #tpu.memory_space<vmem>>, vector<32x32xbf16>
    %cst_13 = arith.constant dense<0.000000e+00> : vector<8x32xf32>
    %33 = tpu.matmul %31, %32, %cst_13 {dimension_numbers = #tpu.dot_dimension_numbers<[1], [0], [0], [1], [0, 0, 1, 1], [], []>} : vector<8x32xbf16>, vector<32x32xbf16>, vector<8x32xf32> -> vector<8x32xf32>
    %c0_14 = arith.constant 0 : index
    %c0_15 = arith.constant 0 : index
    %34 = vector.load %arg7[%c0_14, %c0_15] : memref<1x32xf32, #tpu.memory_space<vmem>>, vector<1x32xf32>
    %35 = vector.shape_cast %34 : vector<1x32xf32> to vector<32xf32>
    %36 = vector.shape_cast %35 : vector<32xf32> to vector<1x32xf32>
    %37 = vector.broadcast %36 : vector<1x32xf32> to vector<8x32xf32>
    %38 = arith.addf %33, %37 : vector<8x32xf32>
    %39 = vector.extract_strided_slice %38 {offsets = [0, 0], sizes = [8, 8], strides = [1, 1]} : vector<8x32xf32> to vector<8x8xf32>
    %40 = vector.extract_strided_slice %38 {offsets = [0, 8], sizes = [8, 8], strides = [1, 1]} : vector<8x32xf32> to vector<8x8xf32>
    %41 = vector.extract_strided_slice %38 {offsets = [0, 16], sizes = [8, 8], strides = [1, 1]} : vector<8x32xf32> to vector<8x8xf32>
    %42 = vector.extract_strided_slice %38 {offsets = [0, 24], sizes = [8, 8], strides = [1, 1]} : vector<8x32xf32> to vector<8x8xf32>
    %43 = vector.shape_cast %39 : vector<8x8xf32> to vector<1x8x8xf32>
    %44 = vector.shape_cast %40 : vector<8x8xf32> to vector<1x8x8xf32>
    %45 = vector.shape_cast %41 : vector<8x8xf32> to vector<1x8x8xf32>
    %46 = vector.shape_cast %42 : vector<8x8xf32> to vector<1x8x8xf32>
    %47 = tpu.concatenate %43, %44, %45, %46 in 0 : vector<1x8x8xf32>, vector<1x8x8xf32>, vector<1x8x8xf32>, vector<1x8x8xf32> -> vector<4x8x8xf32>
    %48 = arith.truncf %47 : vector<4x8x8xf32> to vector<4x8x8xbf16>
    %c0_16 = arith.constant 0 : index
    %c0_17 = arith.constant 0 : index
    %c0_18 = arith.constant 0 : index
    %49 = vector.load %arg13[%c0_16, %c0_17, %c0_18] : memref<4x8x8xbf16, #tpu.memory_space<vmem>>, vector<4x8x8xbf16>
    "tpu.trace_start"() <{level = 10 : i32, message = "hqd,hkd->hqk"}> : () -> ()
    %cst_19 = arith.constant dense<0.000000e+00> : vector<4x8x8xf32>
    %50 = tpu.matmul %48, %49, %cst_19 {dimension_numbers = #tpu.dot_dimension_numbers<[2], [2], [1], [1], [0, 0, 0, 1, 1, 1], [0], [0]>} : vector<4x8x8xbf16>, vector<4x8x8xbf16>, vector<4x8x8xf32> -> vector<4x8x8xf32>
    "tpu.trace_stop"() : () -> ()
    %cst_20 = arith.constant 0.353553385 : f32
    %51 = vector.broadcast %cst_20 : f32 to vector<4x8x8xf32>
    %52 = arith.mulf %50, %51 : vector<4x8x8xf32>
    %cst_21 = arith.constant dense<0xFF800000> : vector<4x8xf32>
    %53 = vector.multi_reduction <maximumf>, %52, %cst_21 [2] : vector<4x8x8xf32> to vector<4x8xf32>
    %54 = vector.shape_cast %53 : vector<4x8xf32> to vector<4x8x1xf32>
    %55 = vector.broadcast %54 : vector<4x8x1xf32> to vector<4x8x8xf32>
    %56 = arith.subf %52, %55 : vector<4x8x8xf32>
    %57 = math.exp %56 : vector<4x8x8xf32>
    %cst_22 = arith.constant dense<0.000000e+00> : vector<4x8xf32>
    %58 = vector.multi_reduction <add>, %57, %cst_22 [2] : vector<4x8x8xf32> to vector<4x8xf32>
    %59 = vector.shape_cast %58 : vector<4x8xf32> to vector<4x8x1xf32>
    %60 = tpu.reciprocal %59 {approx = true} : vector<4x8x1xf32> -> vector<4x8x1xf32>
    %61 = arith.truncf %57 : vector<4x8x8xf32> to vector<4x8x8xbf16>
    %c0_23 = arith.constant 0 : index
    %c0_24 = arith.constant 0 : index
    %c0_25 = arith.constant 0 : index
    %62 = vector.load %arg14[%c0_23, %c0_24, %c0_25] : memref<4x8x8xbf16, #tpu.memory_space<vmem>>, vector<4x8x8xbf16>
    "tpu.trace_start"() <{level = 10 : i32, message = "hqk,hkd->hqd"}> : () -> ()
    %cst_26 = arith.constant dense<0.000000e+00> : vector<4x8x8xf32>
    %63 = tpu.matmul %61, %62, %cst_26 {dimension_numbers = #tpu.dot_dimension_numbers<[2], [1], [1], [2], [0, 0, 0, 1, 1, 2], [0], [0]>} : vector<4x8x8xbf16>, vector<4x8x8xbf16>, vector<4x8x8xf32> -> vector<4x8x8xf32>
    "tpu.trace_stop"() : () -> ()
    %64 = vector.broadcast %60 : vector<4x8x1xf32> to vector<4x8x8xf32>
    %65 = arith.mulf %63, %64 : vector<4x8x8xf32>
    %66 = vector.extract_strided_slice %65 {offsets = [0, 0, 0], sizes = [1, 8, 8], strides = [1, 1, 1]} : vector<4x8x8xf32> to vector<1x8x8xf32>
    %67 = vector.shape_cast %66 : vector<1x8x8xf32> to vector<8x8xf32>
    %68 = vector.extract_strided_slice %65 {offsets = [1, 0, 0], sizes = [1, 8, 8], strides = [1, 1, 1]} : vector<4x8x8xf32> to vector<1x8x8xf32>
    %69 = vector.shape_cast %68 : vector<1x8x8xf32> to vector<8x8xf32>
    %70 = vector.extract_strided_slice %65 {offsets = [2, 0, 0], sizes = [1, 8, 8], strides = [1, 1, 1]} : vector<4x8x8xf32> to vector<1x8x8xf32>
    %71 = vector.shape_cast %70 : vector<1x8x8xf32> to vector<8x8xf32>
    %72 = vector.extract_strided_slice %65 {offsets = [3, 0, 0], sizes = [1, 8, 8], strides = [1, 1, 1]} : vector<4x8x8xf32> to vector<1x8x8xf32>
    %73 = vector.shape_cast %72 : vector<1x8x8xf32> to vector<8x8xf32>
    %74 = tpu.concatenate %67, %69, %71, %73 in 1 : vector<8x8xf32>, vector<8x8xf32>, vector<8x8xf32>, vector<8x8xf32> -> vector<8x32xf32>
    %75 = arith.truncf %74 : vector<8x32xf32> to vector<8x32xbf16>
    %c0_27 = arith.constant 0 : index
    %c0_28 = arith.constant 0 : index
    %76 = vector.load %arg10[%c0_27, %c0_28] : memref<32x32xbf16, #tpu.memory_space<vmem>>, vector<32x32xbf16>
    %cst_29 = arith.constant dense<0.000000e+00> : vector<8x32xf32>
    %77 = tpu.matmul %75, %76, %cst_29 {dimension_numbers = #tpu.dot_dimension_numbers<[1], [0], [0], [1], [0, 0, 1, 1], [], []>} : vector<8x32xbf16>, vector<32x32xbf16>, vector<8x32xf32> -> vector<8x32xf32>
    %c0_30 = arith.constant 0 : index
    %c0_31 = arith.constant 0 : index
    %78 = vector.load %arg11[%c0_30, %c0_31] : memref<1x32xf32, #tpu.memory_space<vmem>>, vector<1x32xf32>
    %79 = vector.shape_cast %78 : vector<1x32xf32> to vector<32xf32>
    %80 = vector.shape_cast %79 : vector<32xf32> to vector<1x32xf32>
    %81 = vector.broadcast %80 : vector<1x32xf32> to vector<8x32xf32>
    %82 = arith.addf %77, %81 : vector<8x32xf32>
    %83 = arith.addf %4, %82 : vector<8x32xf32>
    %c0_32 = arith.constant 0 : index
    %c0_33 = arith.constant 0 : index
    %c0_34 = arith.constant 0 : index
    %84 = vector.load %arg12[%c0_32, %c0_33, %c0_34] : memref<1x8x32xf32, #tpu.memory_space<vmem>>, vector<1x8x32xf32>
    %85 = vector.shape_cast %84 : vector<1x8x32xf32> to vector<8x32xf32>
    %86 = vector.shape_cast %83 : vector<8x32xf32> to vector<1x8x32xf32>
    tpu.vector_store %arg12[%c0_32, %c0_33, %c0_34], %86 {strides = array<i32>} : memref<1x8x32xf32, #tpu.memory_space<vmem>>, vector<1x8x32xf32>,
    return
  }
  func.func @transform_0(%arg0: i32, %arg1: i32) -> (i32, i32, i32) {
    %c0_i32 = arith.constant 0 : i32
    %c0_i32_0 = arith.constant 0 : i32
    %c0_i32_1 = arith.constant 0 : i32
    return %arg0, %c0_i32, %c0_i32_0 : i32, i32, i32
  }
  func.func @transform_1(%arg0: i32, %arg1: i32) -> (i32, i32, i32) {
    %c0_i32 = arith.constant 0 : i32
    %c0_i32_0 = arith.constant 0 : i32
    return %arg0, %arg1, %c0_i32 : i32, i32, i32
  }
  func.func @transform_2(%arg0: i32, %arg1: i32) -> (i32, i32) {
    %c0_i32 = arith.constant 0 : i32
    %c0_i32_0 = arith.constant 0 : i32
    %c0_i32_1 = arith.constant 0 : i32
    return %c0_i32, %c0_i32_0 : i32, i32
  }
  func.func @transform_3(%arg0: i32, %arg1: i32) -> (i32, i32) {
    %c0_i32 = arith.constant 0 : i32
    %c0_i32_0 = arith.constant 0 : i32
    %c0_i32_1 = arith.constant 0 : i32
    return %c0_i32, %c0_i32_0 : i32, i32
  }
  func.func @transform_4(%arg0: i32, %arg1: i32) -> (i32, i32) {
    %c0_i32 = arith.constant 0 : i32
    %c0_i32_0 = arith.constant 0 : i32
    %c0_i32_1 = arith.constant 0 : i32
    return %c0_i32, %c0_i32_0 : i32, i32
  }
  func.func @transform_5(%arg0: i32, %arg1: i32) -> (i32, i32) {
    %c0_i32 = arith.constant 0 : i32
    %c0_i32_0 = arith.constant 0 : i32
    %c0_i32_1 = arith.constant 0 : i32
    return %c0_i32, %c0_i32_0 : i32, i32
  }
  func.func @transform_6(%arg0: i32, %arg1: i32) -> (i32, i32) {
    %c0_i32 = arith.constant 0 : i32
    %c0_i32_0 = arith.constant 0 : i32
    %c0_i32_1 = arith.constant 0 : i32
    return %c0_i32, %c0_i32_0 : i32, i32
  }
  func.func @transform_7(%arg0: i32, %arg1: i32) -> (i32, i32) {
    %c0_i32 = arith.constant 0 : i32
    %c0_i32_0 = arith.constant 0 : i32
    %c0_i32_1 = arith.constant 0 : i32
    return %c0_i32, %c0_i32_0 : i32, i32
  }
  func.func @transform_8(%arg0: i32, %arg1: i32) -> (i32, i32) {
    %c0_i32 = arith.constant 0 : i32
    %c0_i32_0 = arith.constant 0 : i32
    %c0_i32_1 = arith.constant 0 : i32
    return %c0_i32, %c0_i32_0 : i32, i32
  }
  func.func @transform_9(%arg0: i32, %arg1: i32) -> (i32, i32) {
    %c0_i32 = arith.constant 0 : i32
    %c0_i32_0 = arith.constant 0 : i32
    %c0_i32_1 = arith.constant 0 : i32
    return %c0_i32, %c0_i32_0 : i32, i32
  }
  func.func @transform_10(%arg0: i32, %arg1: i32) -> (i32, i32, i32) {
    %c0_i32 = arith.constant 0 : i32
    %c0_i32_0 = arith.constant 0 : i32
    return %arg0, %arg1, %c0_i32 : i32, i32, i32
  }
}

</mosaic_0001>

<bundles_post_ra>
// kernel: tpu_custom_call.1
= control target key start
LH: loop header
LB: loop body
LE: loop exit
PB: predicated region body
PF: predicated region fallthrough
CT: control target
= control target key end

     0   :  { %s2832_s0 = inlined_call_operand.hbm [shape: f32[2,8,32], index: 0, kind: input, shape index: {}]   ;;  %s2833_s1 = inlined_call_operand.hbm [shape: f32[2,8,32], index: 1, kind: input, shape index: {}]   ;;  %s2834_s2 = inlined_call_operand.hbm [shape: f32[1,32], index: 2, kind: input, shape index: {}]   ;;  %s2835_s3 = inlined_call_operand.hbm [shape: f32[1,32], index: 3, kind: input, shape index: {}]   ;;  %s2836_s4 = inlined_call_operand.hbm [shape: bf16[32,32], index: 4, kind: input, shape index: {}]   ;;  %s2837_s5 = inlined_call_operand.hbm [shape: f32[1,32], index: 5, kind: input, shape index: {}]   ;;  %s2838_s6 = inlined_call_operand.hbm [shape: bf16[32,64], index: 6, kind: input, shape index: {}]   ;;  %s2839_s7 = inlined_call_operand.hbm [shape: f32[1,64], index: 7, kind: input, shape index: {}]   ;;  %s2840_s8 = inlined_call_operand.hbm [shape: bf16[32,32], index: 8, kind: input, shape index: {}]   ;;  %s2841_s9 = inlined_call_operand.hbm [shape: f32[1,32], index: 9, kind: input, shape index: {}]   ;;  %s2842_s10 = inlined_call_operand.hbm [shape: f32[2,8,32], index: 10, kind: output, shape index: {}]  }
   0x1   :  { %2848 = sst [smem:[#allocation31_spill]] %s2834_s2 }
   0x2   :  { %2849 = sst [smem:[#allocation32_spill]] %s2835_s3 }
   0x3   :  { %2850 = sst [smem:[#allocation33_spill]] %s2836_s4 }
   0x4   :  { %2851 = sst [smem:[#allocation34_spill]] %s2837_s5 }
   0x5   :  { %2852 = sst [smem:[#allocation35_spill]] %s2838_s6 }
   0x6   :  { %2853 = sst [smem:[#allocation36_spill]] %s2839_s7 }
   0x7   :  { %2854 = sst [smem:[#allocation37_spill]] %s2840_s8 }
   0x8   :  { %2855 = sst [smem:[#allocation38_spill]] %s2842_s10 }
   0x9   :  { %15 = vsyncpa [#allocation5], 0 }
   0xa   :  { %17 = vsyncpa [#allocation5 + $0x1], 0 }
   0xb   :  { %18 = vsyncpa [#allocation8], 0 }
   0xc   :  { %20 = vsyncpa [#allocation8 + $0x1], 0 }
   0xd   :  { %21 = vsyncpa [#allocation11], 0 }
   0xe   :  { %22 = vsyncpa [#allocation14], 0 }
   0xf   :  { %23 = vsyncpa [#allocation17], 0 }
  0x10   :  { %24 = vsyncpa [#allocation20], 0 }
  0x11   :  { %25 = vsyncpa [#allocation6], 0 }
  0x12   :  { %27 = vsyncpa [#allocation6 + $0x1], 0  ;;  %s2324_s13 = smov 0   ;;  %s2326_s14 = smov 0  }
  0x13   :  { %s2328_s15 = smov 0   ;;  %s2330_s16 = smov 0  }
  0x14   :  { %s2332_s17 = smov 0   ;;  %s2334_s18 = smov 0  }
  0x15 LB: > { %2856 = sst [smem:[#allocation30_spill]] %s2237_s16  ;;  %s2355_s19 = sadd.s32 4294967295, %s2245_s18   ;;  %s2245_s18 = sphi %s2334_s18, %s33_s18   ;;  %s2241_s17 = sphi %s2332_s17, %s2895_s17   ;;  %s2237_s16 = sphi %s2330_s16, %s2894_s16   ;;  %s2233_s15 = sphi %s2328_s15, %s2893_s15   ;;  %s2229_s14 = sphi %s2326_s14, %s2892_s14   ;;  %s2225_s13 = sphi %s2324_s13, %s2891_s13  }
  0x16   : > { %p1511_p0 = scmp.ge.s32.totalorder %s2245_s18, 1  ;;  %p2843_p1 = scmp.eq.s32.totalorder %s2355_s19, 0 }
  0x17   : > { %p300_p2 = scmp.lt.s32.totalorder %s2245_s18, 3  ;;  %s2247_s21 = smov [#allocation9]  }
  0x18   : > { %s313_s22 = sshll.u32 %s2247_s21, 4  ;;  %s2248_s23 = smov [#allocation10]   ;;  %s314_s22 = int_to_ptr.vmem [resolvable:$true] %s313_s22 }
  0x19   : > { %p2360_p3 = pnand %p1511_p0, %p300_p2  ;;  %s324_s24 = sshll.u32 %s2248_s23, 4  ;;  %s2373_s24 = int_to_ptr.vmem [resolvable:$true] %s324_s24 }
  0x1a   : > { %s2249_s26 = smov [#allocation13]   ;;  %s2859_s2 = sld [smem:[#allocation31_spill]] }
  0x1b   : > { %s2857_s20 = scalar_select %p2360_p3, 1, 0 }
  0x1c   : > { %p1708_p5 = pneg %p2360_p3  ;;  %s348_s27 = sshll.u32 %s2249_s26, 4  ;;  %s2375_s27 = int_to_ptr.vmem [resolvable:$true] %s348_s27 }
  0x1e   : > { %p2369_p6 = pnand %p1708_p5, %p2843_p1 }
  0x20   : > { %s1855_s30 = scalar_lea.hbm %s2859_s2, 16  ;;  %p2385_p8 = pneg %p2369_p6 }
  0x21   : > { %p1856_p7 = scmp.ne.s32.totalorder %s2859_s2, %s1855_s30  ;;  %p1862_p11 = scmp.lt.u32.totalorder %s1855_s30, %s2859_s2 }
  0x23   : > { %p1858_p9 = pnand %p2385_p8, %p1856_p7 }
  0x25   : > { %p1859_p10 = pneg %p1858_p9 }
  0x27   : > { %p1864_p12 = pnand %p1862_p11, %p1859_p10 }
  0x29   : > { %1867 = shalt.err (!%p1864_p12)
}
  0x2a   : > { %s1868_s28 = scalar_lea.vmem %s314_s22, 16  ;;  %s1875_s29 = scalar_lea.vmem %s314_s22, 32 }
  0x2b   : > { %p1869_p13 = scmp.ne.s32.totalorder %s314_s22, %s1868_s28  ;;  %p1876_p5 = scmp.lt.s32.totalorder %s314_s22, %s314_s22 }
  0x2c   : > { %p1877_p4 = scmp.lt.s32.totalorder %s1875_s29, %s1868_s28 }
  0x2d   : > { %p1871_p0 = pnand %p1869_p13, %p2385_p8 }
  0x2e   : > { %p1878_p1 = por %p1877_p4, %p1876_p5 }
  0x2f   : > { %p1872_p2 = pneg %p1871_p0 }
  0x31   : > { %p1879_p3 = pnand %p1878_p1, %p1872_p2 }
  0x33   : > { %1882 = shalt.err (!%p1879_p3)
}
  0x34   : > { %1711 = dma.hbm_to_vmem [thread:$0]  (!%p2369_p6), %s2859_s2, 16, %s314_s22, [#allocation8]  }
  0x35   : > { %s2861_s3 = sld [smem:[#allocation32_spill]] }
  0x3b   : > { %s1883_s26 = scalar_lea.hbm %s2861_s3, 16 }
  0x3c   : > { %p1884_p7 = scmp.ne.s32.totalorder %s2861_s3, %s1883_s26  ;;  %p1890_p1 = scmp.lt.u32.totalorder %s1883_s26, %s2861_s3 }
  0x3e   : > { %p1886_p9 = pnand %p1884_p7, %p2385_p8 }
  0x40   : > { %p1887_p4 = pneg %p1886_p9 }
  0x42   : > { %p1892_p3 = pnand %p1890_p1, %p1887_p4 }
  0x44   : > { %1895 = shalt.err (!%p1892_p3)
}
  0x45   : > { %s1896_s22 = scalar_lea.vmem %s2373_s24, 16  ;;  %s1903_s10 = scalar_lea.vmem %s2373_s24, 32 }
  0x46   : > { %p1897_p10 = scmp.ne.s32.totalorder %s2373_s24, %s1896_s22  ;;  %p1904_p13 = scmp.lt.s32.totalorder %s2373_s24, %s2373_s24 }
  0x47   : > { %p1905_p0 = scmp.lt.s32.totalorder %s1903_s10, %s1896_s22 }
  0x48   : > { %p1899_p11 = pnand %p1897_p10, %p2385_p8 }
  0x49   : > { %p1906_p2 = por %p1905_p0, %p1904_p13 }
  0x4a   : > { %p1900_p12 = pneg %p1899_p11 }
  0x4c   : > { %p1907_p5 = pnand %p1906_p2, %p1900_p12 }
  0x4e   : > { %1910 = shalt.err (!%p1907_p5)
}
  0x4f   : > { %1714 = dma.hbm_to_vmem [thread:$0]  (!%p2369_p6), %s2861_s3, 16, %s2373_s24, [#allocation11]  }
  0x50   : > { %s2862_s5 = sld [smem:[#allocation34_spill]] }
  0x56   : > { %s1911_s23 = scalar_lea.hbm %s2862_s5, 16 }
  0x57   : > { %p1912_p7 = scmp.ne.s32.totalorder %s2862_s5, %s1911_s23  ;;  %p1918_p1 = scmp.lt.u32.totalorder %s1911_s23, %s2862_s5 }
  0x59   : > { %p1914_p9 = pnand %p1912_p7, %p2385_p8 }
  0x5b   : > { %p1915_p4 = pneg %p1914_p9 }
  0x5d   : > { %p1920_p3 = pnand %p1918_p1, %p1915_p4 }
  0x5f   : > { %1923 = shalt.err (!%p1920_p3)
}
  0x60   : > { %s1924_s24 = scalar_lea.vmem %s2375_s27, 16  ;;  %s1931_s10 = scalar_lea.vmem %s2375_s27, 32 }
  0x61   : > { %p1925_p10 = scmp.ne.s32.totalorder %s2375_s27, %s1924_s24  ;;  %p1932_p13 = scmp.lt.s32.totalorder %s2375_s27, %s2375_s27 }
  0x62   : > { %p1933_p0 = scmp.lt.s32.totalorder %s1931_s10, %s1924_s24 }
  0x63   : > { %p1927_p11 = pnand %p1925_p10, %p2385_p8 }
  0x64   : > { %p1934_p2 = por %p1933_p0, %p1932_p13 }
  0x65   : > { %p1928_p12 = pneg %p1927_p11 }
  0x67   : > { %p1935_p5 = pnand %p1934_p2, %p1928_p12 }
  0x69   : > { %1938 = shalt.err (!%p1935_p5)
}
  0x6a   : > { %1720 = dma.hbm_to_vmem [thread:$0]  (!%p2369_p6), %s2862_s5, 16, %s2375_s27, [#allocation14]  }
  0x6b   : > { %s2250_s12 = smov [#allocation16]   ;;  %s2251_s23 = smov [#allocation12]  }
  0x6c   : > { %s372_s30 = sshll.u32 %s2250_s12, 4  ;;  %s334_s26 = sshll.u32 %s2251_s23, 4  ;;  %s373_s30 = int_to_ptr.vmem [resolvable:$true] %s372_s30  ;;  %s335_s26 = int_to_ptr.vmem [resolvable:$true] %s334_s26 }
  0x6d   : > { %s2863_s7 = sld [smem:[#allocation36_spill]] }
  0x73   : > { %s1939_s22 = scalar_lea.hbm %s2863_s7, 16 }
  0x74   : > { %p1940_p7 = scmp.ne.s32.totalorder %s2863_s7, %s1939_s22  ;;  %p1946_p1 = scmp.lt.u32.totalorder %s1939_s22, %s2863_s7 }
  0x76   : > { %p1942_p9 = pnand %p1940_p7, %p2385_p8 }
  0x78   : > { %p1943_p4 = pneg %p1942_p9 }
  0x7a   : > { %p1948_p3 = pnand %p1946_p1, %p1943_p4 }
  0x7c   : > { %1951 = shalt.err (!%p1948_p3)
}
  0x7d   : > { %s1952_s27 = scalar_lea.vmem %s373_s30, 16  ;;  %s1959_s11 = scalar_lea.vmem %s373_s30, 32 }
  0x7e   : > { %p1953_p10 = scmp.ne.s32.totalorder %s373_s30, %s1952_s27  ;;  %p1960_p13 = scmp.lt.s32.totalorder %s373_s30, %s373_s30 }
  0x7f   : > { %p1961_p0 = scmp.lt.s32.totalorder %s1959_s11, %s1952_s27 }
  0x80   : > { %p1955_p11 = pnand %p1953_p10, %p2385_p8 }
  0x81   : > { %p1962_p2 = por %p1961_p0, %p1960_p13 }
  0x82   : > { %p1956_p12 = pneg %p1955_p11 }
  0x84   : > { %p1963_p5 = pnand %p1962_p2, %p1956_p12 }
  0x86   : > { %1966 = shalt.err (!%p1963_p5)
}
  0x87   : > { %1726 = dma.hbm_to_vmem [thread:$0]  (!%p2369_p6), %s2863_s7, 16, %s373_s30, [#allocation17]  }
  0x88   : > { %s2864_s4 = sld [smem:[#allocation33_spill]] }
  0x8e   : > { %s1967_s29 = scalar_lea.hbm %s2864_s4, 256 }
  0x8f   : > { %p1968_p7 = scmp.ne.s32.totalorder %s2864_s4, %s1967_s29  ;;  %p1974_p1 = scmp.lt.u32.totalorder %s1967_s29, %s2864_s4 }
  0x91   : > { %p1970_p9 = pnand %p1968_p7, %p2385_p8 }
  0x93   : > { %p1971_p4 = pneg %p1970_p9 }
  0x95   : > { %p1976_p3 = pnand %p1974_p1, %p1971_p4 }
  0x97   : > { %1979 = shalt.err (!%p1976_p3)
}
  0x98   : > { %s1980_s27 = scalar_lea.vmem %s335_s26, 256  ;;  %p1988_p13 = scmp.lt.s32.totalorder %s335_s26, %s335_s26 }
  0x99   : > { %p1981_p10 = scmp.ne.s32.totalorder %s335_s26, %s1980_s27  ;;  %p1989_p0 = scmp.lt.s32.totalorder %s1980_s27, %s1980_s27 }
  0x9b   : > { %p1983_p11 = pnand %p1981_p10, %p2385_p8  ;;  %p1990_p2 = por %p1989_p0, %p1988_p13 }
  0x9d   : > { %p1984_p12 = pneg %p1983_p11 }
  0x9f   : > { %p1991_p5 = pnand %p1990_p2, %p1984_p12 }
  0xa1   : > { %1994 = shalt.err (!%p1991_p5)
}
  0xa2   : > { %s2252_s30 = smov 64   ;;  %s2253_s11 = smov 4  }
  0xa3   : > { %1717 = dma.hbm_to_vmem [thread:$0]  (!%p2369_p6), %s2864_s4, 256, %s335_s26, [#allocation11], %s2252_s30, %s2252_s30, %s2253_s11  }
  0xa4   : > { %s2254_s2 = smov [#allocation15]   ;;  %s2255_s29 = smov [#allocation18]  }
  0xa5   : > { %s358_s28 = sshll.u32 %s2254_s2, 4  ;;  %s382_s22 = sshll.u32 %s2255_s29, 4  ;;  %s359_s28 = int_to_ptr.vmem [resolvable:$true] %s358_s28  ;;  %s383_s22 = int_to_ptr.vmem [resolvable:$true] %s382_s22 }
  0xa6   : > { %s2865_s6 = sld [smem:[#allocation35_spill]] }
  0xac   : > { %s1995_s16 = scalar_lea.hbm %s2865_s6, 256 }
  0xad   : > { %p1996_p7 = scmp.ne.s32.totalorder %s2865_s6, %s1995_s16  ;;  %p2002_p1 = scmp.lt.u32.totalorder %s1995_s16, %s2865_s6 }
  0xaf   : > { %p1998_p9 = pnand %p1996_p7, %p2385_p8 }
  0xb1   : > { %p1999_p4 = pneg %p1998_p9 }
  0xb3   : > { %p2004_p3 = pnand %p2002_p1, %p1999_p4 }
  0xb5   : > { %2007 = shalt.err (!%p2004_p3)
}
  0xb6   : > { %s2008_s26 = scalar_lea.vmem %s359_s28, 256  ;;  %p2016_p13 = scmp.lt.s32.totalorder %s359_s28, %s359_s28 }
  0xb7   : > { %p2009_p10 = scmp.ne.s32.totalorder %s359_s28, %s2008_s26  ;;  %p2017_p0 = scmp.lt.s32.totalorder %s2008_s26, %s2008_s26 }
  0xb9   : > { %p2011_p11 = pnand %p2009_p10, %p2385_p8  ;;  %p2018_p2 = por %p2017_p0, %p2016_p13 }
  0xbb   : > { %p2012_p12 = pneg %p2011_p11 }
  0xbd   : > { %p2019_p5 = pnand %p2018_p2, %p2012_p12 }
  0xbf   : > { %2022 = shalt.err (!%p2019_p5)
}
  0xc0   : > { %1723 = dma.hbm_to_vmem [thread:$0]  (!%p2369_p6), %s2865_s6, 256, %s359_s28, [#allocation14], %s2252_s30, %s2252_s30, %s2253_s11  }
  0xc1   : > { %s2866_s8 = sld [smem:[#allocation37_spill]] }
  0xc7   : > { %s2023_s23 = scalar_lea.hbm %s2866_s8, 256 }
  0xc8   : > { %p2024_p7 = scmp.ne.s32.totalorder %s2866_s8, %s2023_s23  ;;  %p2030_p1 = scmp.lt.u32.totalorder %s2023_s23, %s2866_s8 }
  0xca   : > { %p2026_p9 = pnand %p2024_p7, %p2385_p8 }
  0xcc   : > { %p2027_p4 = pneg %p2026_p9 }
  0xce   : > { %p2032_p3 = pnand %p2030_p1, %p2027_p4 }
  0xd0   : > { %2035 = shalt.err (!%p2032_p3)
}
  0xd1   : > { %s2036_s16 = scalar_lea.vmem %s383_s22, 256  ;;  %p2044_p13 = scmp.lt.s32.totalorder %s383_s22, %s383_s22 }
  0xd2   : > { %p2037_p10 = scmp.ne.s32.totalorder %s383_s22, %s2036_s16  ;;  %p2045_p0 = scmp.lt.s32.totalorder %s2036_s16, %s2036_s16 }
  0xd4   : > { %p2039_p11 = pnand %p2037_p10, %p2385_p8  ;;  %p2046_p2 = por %p2045_p0, %p2044_p13 }
  0xd6   : > { %p2040_p12 = pneg %p2039_p11 }
  0xd8   : > { %p2047_p5 = pnand %p2046_p2, %p2040_p12 }
  0xda   : > { %2050 = shalt.err (!%p2047_p5)
}
  0xdb   : > { %1729 = dma.hbm_to_vmem [thread:$0]  (!%p2369_p6), %s2866_s8, 256, %s383_s22, [#allocation17], %s2252_s30, %s2252_s30, %s2253_s11  }
  0xdc   : > { %s2256_s26 = smov [#allocation19]   ;;  %s2051_s12 = scalar_lea.hbm %s2841_s9, 16 }
  0xdd   : > { %s396_s3 = sshll.u32 %s2256_s26, 4  ;;  %p2052_p7 = scmp.ne.s32.totalorder %s2841_s9, %s2051_s12  ;;  %s397_s3 = int_to_ptr.vmem [resolvable:$true] %s396_s3 }
  0xde   : > { %p2058_p1 = scmp.lt.u32.totalorder %s2051_s12, %s2841_s9 }
  0xdf   : > { %p2054_p9 = pnand %p2052_p7, %p2385_p8 }
  0xe1   : > { %p2055_p4 = pneg %p2054_p9 }
  0xe3   : > { %p2060_p3 = pnand %p2058_p1, %p2055_p4 }
  0xe5   : > { %2063 = shalt.err (!%p2060_p3)
}
  0xe6   : > { %s2064_s30 = scalar_lea.vmem %s397_s3, 16  ;;  %s2071_s11 = scalar_lea.vmem %s397_s3, 32 }
  0xe7   : > { %p2065_p10 = scmp.ne.s32.totalorder %s397_s3, %s2064_s30  ;;  %p2072_p13 = scmp.lt.s32.totalorder %s397_s3, %s397_s3 }
  0xe8   : > { %p2073_p0 = scmp.lt.s32.totalorder %s2071_s11, %s2064_s30 }
  0xe9   : > { %p2067_p11 = pnand %p2065_p10, %p2385_p8 }
  0xea   : > { %p2074_p2 = por %p2073_p0, %p2072_p13 }
  0xeb   : > { %p2068_p12 = pneg %p2067_p11 }
  0xed   : > { %p2075_p5 = pnand %p2074_p2, %p2068_p12 }
  0xef   : > { %2078 = shalt.err (!%p2075_p5)
}
  0xf0   : > { %1732 = dma.hbm_to_vmem [thread:$0]  (!%p2369_p6), %s2841_s9, 16, %s397_s3, [#allocation20]  }
  0xf1   : > { %s1510_s21 = sadd.s32 4294967294, %s2245_s18   ;;  %s45_s16 = sadd.s32 1, %s2241_s17 }
  0xf2   : > { %p47_p8 = scmp.ge.s32.totalorder %s45_s16, 2  ;;  %s52_s25 = sadd.s32 1, %s2233_s15 }
  0xf3   : > { %p59_p7 = scmp.ne.s32.totalorder %s2233_s15, %s2229_s14  ;;  %p60_p9 = scmp.eq.s32.totalorder %s2245_s18, 0 }
  0xf4   : > { %s2897_s16 = smov (%p47_p8, %s45_s16), 0  ;;  %p65_p1 = scmp.ne.s32.totalorder %s2229_s14, %s2225_s13 }
  0xf5   : > { %p2556_p4 = por %p60_p9, %p59_p7  ;;  %s49_s27 = ssub.s32 %s2241_s17, %s2897_s16 }
  0xf6   : > { %p287_p6 = scmp.eq.s32.totalorder %s2355_s19, 1  ;;  %p50_p3 = scmp.eq.s32.totalorder %s49_s27, 0 }
  0xf7   : > { %p2868_p10 = scmp.eq.s32.totalorder %s2355_s19, 0  ;;  %p293_p13 = scmp.eq.s32.totalorder %s1510_s21, 1 }
  0xf8   : > { %p2571_p12 = por %p287_p6, %p59_p7  ;;  %p1752_p2 = scmp.lt.s32.totalorder %s2245_s18, 2 }
  0xf9   : > { %p2567_p11 = por %p2868_p10, %p65_p1  ;;  %p2578_p0 = por %p293_p13, %p65_p1 }
  0xfa   : > { %s2870_s3 = scalar_select %p2571_p12, 1, 0 }
  0xfb   : > { %s2869_s26 = scalar_select %p2567_p11, 1, 0 }
  0xfc   : > { %s2576_s5 = scalar_select %p50_p3, %s2233_s15, %s52_s25  }
  0xfd   : > { %s2871_s7 = scalar_select %p2578_p0, 1, 0 }
  0xfe   : > { %s407_s12 = sand.u32 1, %s2233_s15   ;;  %s1522_s23 = sshll.u32 %s2241_s17, 7 }
  0xff   : > { %s2585_s2 = sshll.u32 %s407_s12, 3  ;;  %s2590_s30 = scalar_lea.hbm %s2832_s0, %s1522_s23 }
 0x100   : > { %s411_s11 = scalar_lea.vmem [#allocation4], %s2585_s2  ;;  %p2595_p5 = pnand %p1752_p2, %p2556_p4 }
 0x101   : > { %s418_s22 = sshll.u32 %s411_s11, 4  ;;  %s2604_s27 = scalar_lea.hbm %s2833_s1, %s1522_s23  ;;  %s2599_s22 = int_to_ptr.vmem [resolvable:$true] %s418_s22 }
 0x102   : > { %s408_s29 = scalar_lea.sflag [#allocation5], %s407_s12  ;;  %s2079_s24 = scalar_lea.hbm %s2590_s30, 128 }
 0x103   : > { %p2080_p8 = scmp.ne.s32.totalorder %s2590_s30, %s2079_s24  ;;  %p2081_p7 = pneg %p2595_p5 }
 0x104   : > { %s2084_s4 = scalar_lea.hbm %s2832_s0, 256  ;;  %p2085_p1 = scmp.lt.u32.totalorder %s2590_s30, %s2832_s0 }
 0x105   : > { %p2082_p9 = pnand %p2081_p7, %p2080_p8  ;;  %p2086_p6 = scmp.lt.u32.totalorder %s2084_s4, %s2079_s24 }
 0x106   : > { %p2088_p10 = scmp.lt.u32.totalorder %s2079_s24, %s2590_s30 }
 0x107   : > { %p2083_p4 = pneg %p2082_p9  ;;  %p2087_p3 = por %p2086_p6, %p2085_p1 }
 0x109   : > { %p2089_p13 = por %p2088_p10, %p2087_p3 }
 0x10b   : > { %p2090_p2 = pnand %p2089_p13, %p2083_p4 }
 0x10d   : > { %2093 = shalt.err (!%p2090_p2)
}
 0x10e   : > { %s2094_s12 = scalar_lea.vmem %s2599_s22, 128  ;;  %s2257_s23 = smov [#allocation4]  }
 0x10f   : > { %p2095_p8 = scmp.ne.s32.totalorder %s2599_s22, %s2094_s12  ;;  %s2099_s21 = sshll.u32 %s2257_s23, 4  ;;  %s2100_s21 = int_to_ptr.vmem [resolvable:$false] %s2099_s21 }
 0x110   : > { %s2101_s6 = scalar_lea.vmem %s2100_s21, 256  ;;  %p2102_p12 = scmp.lt.s32.totalorder %s2599_s22, %s2100_s21 }
 0x111   : > { %p2097_p9 = pnand %p2095_p8, %p2081_p7  ;;  %p2103_p1 = scmp.lt.s32.totalorder %s2101_s6, %s2094_s12 }
 0x113   : > { %p2098_p0 = pneg %p2097_p9  ;;  %p2104_p6 = por %p2103_p1, %p2102_p12 }
 0x115   : > { %p2105_p3 = pnand %p2104_p6, %p2098_p0 }
 0x117   : > { %2108 = shalt.err (!%p2105_p3)
}
 0x118   : > { %1736 = dma.hbm_to_vmem [thread:$0]  (!%p2595_p5), %s2590_s30, 128, %s2599_s22, %s408_s29  }
 0x119   : > { %s425_s4 = sand.u32 1, %s2245_s18   ;;  %s429_s8 = scalar_lea.vmem [#allocation7], %s2585_s2 }
 0x11a   : > { %s437_s25 = sshll.u32 %s429_s8, 4  ;;  %s426_s24 = scalar_lea.sflag [#allocation8], %s425_s4  ;;  %s438_s25 = int_to_ptr.vmem [resolvable:$true] %s437_s25 }
 0x11b   : > { %s2109_s28 = scalar_lea.hbm %s2604_s27, 128  ;;  %s2114_s23 = scalar_lea.hbm %s2833_s1, 256 }
 0x11c   : > { %p2110_p12 = scmp.ne.s32.totalorder %s2604_s27, %s2109_s28  ;;  %p2115_p10 = scmp.lt.u32.totalorder %s2604_s27, %s2833_s1 }
 0x11d   : > { %p2116_p13 = scmp.lt.u32.totalorder %s2114_s23, %s2109_s28  ;;  %p2118_p8 = scmp.lt.u32.totalorder %s2109_s28, %s2604_s27 }
 0x11e   : > { %p2112_p0 = pnand %p2110_p12, %p2081_p7 }
 0x11f   : > { %p2117_p2 = por %p2116_p13, %p2115_p10 }
 0x120   : > { %p2113_p4 = pneg %p2112_p0 }
 0x121   : > { %p2119_p9 = por %p2118_p8, %p2117_p2 }
 0x123   : > { %p2120_p1 = pnand %p2119_p9, %p2113_p4 }
 0x125   : > { %2123 = shalt.err (!%p2120_p1)
}
 0x126   : > { %s2124_s2 = scalar_lea.vmem %s438_s25, 128  ;;  %s2258_s30 = smov [#allocation7]  }
 0x127   : > { %p2125_p6 = scmp.ne.s32.totalorder %s438_s25, %s2124_s2  ;;  %s2129_s22 = sshll.u32 %s2258_s30, 4  ;;  %s2130_s22 = int_to_ptr.vmem [resolvable:$false] %s2129_s22 }
 0x128   : > { %s2131_s29 = scalar_lea.vmem %s2130_s22, 256  ;;  %p2132_p0 = scmp.lt.s32.totalorder %s438_s25, %s2130_s22 }
 0x129   : > { %p2127_p3 = pnand %p2125_p6, %p2081_p7  ;;  %p2133_p11 = scmp.lt.s32.totalorder %s2131_s29, %s2124_s2 }
 0x12b   : > { %p2128_p12 = pneg %p2127_p3  ;;  %p2134_p10 = por %p2133_p11, %p2132_p0 }
 0x12d   : > { %p2135_p13 = pnand %p2134_p10, %p2128_p12 }
 0x12f   : > { %2138 = shalt.err (!%p2135_p13)
}
 0x130   : > { %1739 = dma.hbm_to_vmem [thread:$0]  (!%p2595_p5), %s2604_s27, 128, %s438_s25, %s426_s24  }
 0x131   : > { %p2873_p4 = scmp.ne.s32.totalorder %s2857_s20, 0 }
 0x132   : > { %s2655_s4 = sand.u32 (!%p2873_p4), 1, %s2229_s14   ;;  %p2874_p11 = scmp.ne.s32.totalorder (!%p2873_p4), %s2869_s26, 0 }
 0x133   : > { %446 = sbr.rel (%p2873_p4) target bundleno = 1952 (0x7a0), region = 60  ;;  %s2658_s8 = sshll.u32 (!%p2873_p4), %s2655_s4, 3 }
 0x134   : > { %s449_s28 = scalar_lea.sflag (!%p2873_p4), [#allocation5], %s2655_s4  ;;  %s452_s11 = scalar_lea.vmem (!%p2873_p4), [#allocation4], %s2658_s8 }
 0x13a   : > { %2192 = dma.done.wait (%p2874_p11), %s449_s28, 128  }
 0x13b   : > { %2194 = vsyncadd (%p2874_p11), %s449_s28, 4294967168  ;;  %s457_s20 = sand.u32 1, %s2355_s19   ;;  %s461_s27 = scalar_lea.vmem [#allocation7], %s2658_s8 }
 0x13c   : > { %s458_s10 = scalar_lea.sflag [#allocation8], %s457_s20 }
 0x13d   : > { %2196 = dma.done.wait (%p2874_p11), %s458_s10, 128  }
 0x13e   : > { %2198 = vsyncadd (%p2874_p11), %s458_s10, 4294967168  ;;  %p2875_p5 = scmp.eq.s32.totalorder %s2355_s19, 0 }
 0x140   : > { %2200 = dma.done.wait (%p2875_p5), [#allocation8], 16   ;;  %p2876_p7 = pmov %p2875_p5 }
 0x141   : > { %p2877_p2 = pmov %p2875_p5 }
 0x142   : > { %2202 = vsyncadd (%p2876_p7), [#allocation8], 4294967280 }
 0x143   : > { %2204 = dma.done.wait (%p2877_p2), [#allocation11], 272   ;;  %p2878_p8 = pmov %p2877_p2 }
 0x144   : > { %p2879_p9 = pmov %p2877_p2 }
 0x145   : > { %2206 = vsyncadd (%p2878_p8), [#allocation11], 4294967024 }
 0x146   : > { %2208 = dma.done.wait (%p2879_p9), [#allocation14], 272   ;;  %p2880_p1 = pmov %p2877_p2 }
 0x148   : > { %2210 = vsyncadd (%p2880_p1), [#allocation14], 4294967024  ;;  %p2881_p6 = pmov %p2880_p1 }
 0x149   : > { %p2882_p3 = pmov %p2880_p1 }
 0x14a   : > { %2212 = dma.done.wait (%p2881_p6), [#allocation17], 272  }
 0x14b   : > { %2214 = vsyncadd (%p2882_p3), [#allocation17], 4294967024  ;;  %p2883_p12 = pmov %p2880_p1 }
 0x14c   : > { %p2884_p0 = pmov %p2880_p1 }
 0x14d   : > { %2216 = dma.done.wait (%p2883_p12), [#allocation20], 16  }
 0x14e   : > { %2218 = vsyncadd (%p2884_p0), [#allocation20], 4294967280  ;;  %vm541_vm0 = vcmask 261120   ;;  %v540_v0 = vld [vmem:[%s452_s11] sm:$0xff]  ;;  %v2692_v1 = vld [vmem:[%s461_s27] sm:$0xff]  ;;  %v2259_v16 = vmov 0.0  }
 0x14f   : > { %v542_v2 = vsel %vm541_vm0, %v540_v0, 0.0  ;;  %v688_v3 = vsel %vm541_vm0, %v2692_v1, 0.0  ;;  %v1829_v14 = vld [vmem:[#allocation15] sm:$0xff]   ;;  %v1831_v15 = vld [vmem:[#allocation12] sm:$0xff]   ;;  %1598 = vmatprep.subr.bf16.mxu0 %v2259_v16  ;;  %1606 = vmatprep.subr.bf16.mxu1 %v2259_v16  ;;  %vm2260_vm1 = vmmov 0   ;;  %v1832_v18 = vld [vmem:[#allocation12 + $0x8] sm:$0xff]  }
 0x150   : > { %543 = vadd.xlane.f32.xlu0 %v542_v2  ;;  %1599 = vmatpush3.bf16.msra.mxu0 %v1829_v14  ;;  %v1830_v17 = vld [vmem:[#allocation15 + $0x8] sm:$0xff]   ;;  %v1539_v37 = vld [vmem:[#allocation16] ss:$0 sm:$0xff]  ;;  %vm653_vm2 = vcmask 60416   ;;  %v1549_v42 = vld [vmem:[#allocation13] ss:$0 sm:$0xff] }
 0x151   : > { %1607 = vmatpush3.bf16.msra.mxu1 %v1831_v15  ;;  %1600 = vmatprep.subr.bf16.mxu0 %v2259_v16  ;;  %v1537_v26 = vld [vmem:[#allocation9] ss:$0 sm:$0xff]  ;;  %v1538_v28 = vld [vmem:[#allocation10] ss:$0 sm:$0xff]  ;;  %s2261_s19 = smov 120   ;;  %s2262_s26 = smov 112  }
 0x152   : > { %1602 = vmatprep.mubr.msk.bf16.mxu0 %vm2260_vm1, %v2259_v16  ;;  %1608 = vmatprep.subr.bf16.mxu1 %v2259_v16  ;;  %s2263_s25 = smov 104   ;;  %vm803_vm3 = vcmask 64512   ;;  %s2264_s24 = smov 96   ;;  %vm1043_vm4 = vcmask 1043456   ;;  %vm1242_vm5 = vcmask 130048   ;;  %vm1244_vm6 = vcmask 195584  }
 0x153   : > { %1610 = vmatprep.mubr.msk.bf16.mxu1 %vm2260_vm1, %v2259_v16  ;;  %s2265_s12 = smov 8   ;;  %s2266_s23 = smov 16  }
 0x154   : > { %689 = vadd.xlane.f32.xlu0 %v688_v3  ;;  %1601 = vmatpush3.bf16.msra.mxu0 %v1830_v17  ;;  %s2267_s21 = smov 24   ;;  %s2885_s6 = sld [smem:[#allocation30_spill]] }
 0x155   : > { %1614 = vmatprep.subr.bf16.mxu0 %v2259_v16  ;;  %1609 = vmatpush3.bf16.msra.mxu1 %v1832_v18  ;;  %s534_s30 = scalar_lea.vmem [#allocation21], %s2658_s8  ;;  %s2886_s11 = sld [smem:[#allocation38_spill]] }
 0x156   : > { %1620 = vmatprep.subr.bf16.mxu1 %v2259_v16  ;;  %s1330_s22 = sshll.u32 %s534_s30, 4  ;;  %s1316_s8 = scalar_lea.sflag [#allocation6], %s2655_s4  ;;  %s2784_s22 = int_to_ptr.vmem [resolvable:$true] %s1330_s22 }
 0x157   : > { %s2139_s10 = scalar_lea.vmem %s2784_s22, 128  ;;  %p2887_p13 = scmp.ne.s32.totalorder %s2870_s3, 0 }
 0x158   : > { %p2140_p10 = scmp.ne.s32.totalorder %s2784_s22, %s2139_s10  ;;  %s2268_s27 = smov [#allocation21]  }
 0x15a   : > { %s1566_s2 = sshll.u32 %s2885_s6, 7  ;;  %p2141_p4 = pnand %p2140_p10, %p2887_p13 }
 0x15b   : > { %s2782_s20 = scalar_lea.hbm %s2886_s11, %s1566_s2 }
 0x15c   : > { %p2142_p11 = pneg %p2141_p4 }
 0x1dd   : > { %v544_v4 = vpop.xlane.xlu0 %543 }
 0x1de   : > { %v546_v5 = vmul.f32 0.03125, %v544_v4 }
 0x1e0   : > { %v547_v6 = vsub.f32 %v540_v0, %v546_v5 }
 0x1e1   : > { %v690_v7 = vpop.xlane.xlu0 %689 }
 0x1e2   : > { %v692_v8 = vmul.f32 0.03125, %v690_v7  ;;  %v548_v9 = vmul.f32 %v547_v6, %v547_v6 }
 0x1e4   : > { %v693_v10 = vsub.f32 %v2692_v1, %v692_v8  ;;  %v549_v11 = vsel %vm541_vm0, %v548_v9, 0.0 }
 0x1e5   : > { %550 = vadd.xlane.f32.xlu1 %v549_v11 }
 0x1e6   : > { %v694_v12 = vmul.f32 %v693_v10, %v693_v10 }
 0x1e8   : > { %v695_v13 = vsel %vm541_vm0, %v694_v12, 0.0 }
 0x1e9   : > { %696 = vadd.xlane.f32.xlu1 %v695_v13 }
 0x272   : > { %v551_v19 = vpop.xlane.xlu1 %550 }
 0x273   : > { %v552_v20 = vmul.f32 0.03125, %v551_v19 }
 0x275   : > { %v553_v21 = vadd.f32 1e-05, %v552_v20 }
 0x276   : > { %v697_v22 = vpop.xlane.xlu1 %696 }
 0x277   : > { %1835 = vrsqrt.f32 %v553_v21  ;;  %v698_v23 = vmul.f32 0.03125, %v697_v22 }
 0x279   : > { %v699_v24 = vadd.f32 1e-05, %v698_v23 }
 0x27b   : > { %1837 = vrsqrt.f32 %v699_v24 }
 0x281   : > { %v1836_v25 = vpop.eup %1835 }
 0x282   : > { %v555_v27 = vmul.f32 %v1836_v25, %v547_v6 }
 0x284   : > { %v563_v29 = vmul.f32 %v1537_v26, %v555_v27 }
 0x285   : > { %v1838_v30 = vpop.eup %1837 }
 0x286   : > { %v571_v31 = vadd.f32 %v1538_v28, %v563_v29  ;;  %v701_v32 = vmul.f32 %v1838_v30, %v693_v10 }
 0x288   : > { %v572_v33 = vpack.c.bf16 %v571_v31, %v571_v31  ;;  %v709_v34 = vmul.f32 %v1537_v26, %v701_v32 }
 0x28a   : > { %1603 = vmatmul.mubr.msk.bf16.vlgmr.msra.gmra.mrb[0].mxu0 %vm541_vm0, %v572_v33  ;;  %v717_v35 = vadd.f32 %v1538_v28, %v709_v34 }
 0x28b   : > { %1616 = vmatprep.mubr.msk.bf16.mxu0 %vm2260_vm1, %v2259_v16 }
 0x28c   : > { %v718_v36 = vpack.c.bf16 %v717_v35, %v717_v35 }
 0x28e   : > { %1611 = vmatmul.mubr.msk.bf16.vlgmr.msra.gmra.mrb[0].mxu1 %vm541_vm0, %v718_v36 }
 0x28f   : > { %1622 = vmatprep.mubr.msk.bf16.mxu1 %vm2260_vm1, %v2259_v16 }
 0x35d   : > { %v633_v38 = vpop.f32.mrb[0].mxu0 }
 0x35e   : > { %v634_v39 = vadd.f32 %v1539_v37, %v633_v38  ;;  %v1604_v40 = vpop.f32.mrb[1].mxu0 }
 0x35f   : > { %v636_v41 = vpop.f32.mrb[2].mxu0 }
 0x360   : > { %v2716_v43 = vpack.c.bf16 %v634_v39, %v634_v39  ;;  %640 = vrot.lane.b32.xlu0 %v634_v39, %s2261_s19  ;;  %v1605_v44 = vpop.f32.mrb[3].mxu0  ;;  %643 = vrot.lane.b32.xlu1 %v634_v39, %s2262_s26 }
 0x361   : > { %v779_v45 = vpop.f32.mrb[0].mxu1 }
 0x362   : > { %654 = vst.msk [vmem:[#allocation2] sm:$0xf] %vm653_vm2, %v2716_v43  ;;  %v780_v46 = vadd.f32 %v1549_v42, %v779_v45  ;;  %v1612_v47 = vpop.f32.mrb[1].mxu1 }
 0x363   : > { %v782_v48 = vpop.f32.mrb[2].mxu1 }
 0x364   : > { %646 = vrot.lane.b32.xlu1 %v634_v39, %s2263_s25  ;;  %789 = vrot.lane.b32.xlu0 %v780_v46, %s2262_s26  ;;  %v1613_v49 = vpop.f32.mrb[3].mxu1  ;;  %v795_v52 = vpack.c.bf16 %v780_v46, %v780_v46 }
 0x368   : > { %786 = vrot.lane.b32.xlu1 %v780_v46, %s2261_s19  ;;  %s2143_s19 = sshll.u32 %s2268_s27, 4  ;;  %s2144_s19 = int_to_ptr.vmem [resolvable:$false] %s2143_s19 }
 0x369   : > { %v799_v50 = vld [vmem:[#allocation2] sm:$0xf]  ;;  %s2145_s26 = scalar_lea.vmem %s2144_s19, 256  ;;  %p2146_p5 = scmp.lt.s32.totalorder %s2784_s22, %s2144_s19 }
 0x36a   : > { %v808_v51 = vsel %vm803_vm3, %v799_v50, 0  ;;  %p2147_p7 = scmp.lt.s32.totalorder %s2145_s26, %s2139_s10 }
 0x36b   : > { %1615 = vmatpush3.bf16.xpose.msra.mxu0 %v808_v51 }
 0x36c   : > { %792 = vrot.lane.b32.xlu1 %v780_v46, %s2263_s25  ;;  %1626 = vmatprep.subr.bf16.mxu0 %v2259_v16  ;;  %p2148_p2 = por %p2147_p7, %p2146_p5 }
 0x36e   : > { %p2149_p8 = pnand %p2148_p2, %p2142_p11 }
 0x372   : > { %1617 = vmatmul.mubr.msk.bf16.vlgmr.msra.gmra.mrb[4].mxu0 %vm803_vm3, %v795_v52 }
 0x373   : > { %1628 = vmatprep.mubr.msk.bf16.mxu0 %vm2260_vm1, %v2259_v16 }
 0x3d2   : > { %v644_v53 = vpop.permute.xlu1 %643  ;;  %v641_v54 = vpop.permute.xlu0 %640 }
 0x3d3   : > { %v651_v55 = vpack.c.bf16 %v644_v53, %v644_v53  ;;  %v650_v56 = vpack.c.bf16 %v641_v54, %v641_v54 }
 0x3d5   : > { %656 = vst.msk [vmem:[#allocation2 + $0x8] sm:$0xf] %vm653_vm2, %v651_v55  ;;  %655 = vst.msk [vmem:[#allocation2 + $0x4] sm:$0xf] %vm653_vm2, %v650_v56 }
 0x3d6   : > { %v647_v57 = vpop.permute.xlu1 %646  ;;  %v790_v63 = vpop.permute.xlu0 %789 }
 0x3d7   : > { %v652_v58 = vpack.c.bf16 %v647_v57, %v647_v57  ;;  %v797_v3 = vpack.c.bf16 %v790_v63, %v790_v63 }
 0x3d9   : > { %657 = vst.msk [vmem:[#allocation2 + $0xc] sm:$0xf] %vm653_vm2, %v652_v58 }
 0x3da   : > { %v787_v0 = vpop.permute.xlu1 %786 }
 0x3db   : > { %v796_v4 = vpack.c.bf16 %v787_v0, %v787_v0 }
 0x3dc   : > { %v801_v59 = vld [vmem:[#allocation2 + $0x8] sm:$0xf]  ;;  %v800_v60 = vld [vmem:[#allocation2 + $0x4] sm:$0xf] }
 0x3dd   : > { %v900_v61 = vsel %vm803_vm3, %v801_v59, 0  ;;  %v854_v62 = vsel %vm803_vm3, %v800_v60, 0 }
 0x3de   : > { %1627 = vmatpush3.bf16.xpose.msra.mxu0 %v900_v61  ;;  %1621 = vmatpush3.bf16.xpose.msra.mxu1 %v854_v62  ;;  %v793_v6 = vpop.permute.xlu1 %792 }
 0x3df   : > { %1632 = vmatprep.subr.bf16.mxu1 %v2259_v16  ;;  %1638 = vmatprep.subr.bf16.mxu0 %v2259_v16  ;;  %v798_v7 = vpack.c.bf16 %v793_v6, %v793_v6 }
 0x3e0   : > { %v802_v2 = vld [vmem:[#allocation2 + $0xc] sm:$0xf] }
 0x3e1   : > { %v946_v5 = vsel %vm803_vm3, %v802_v2, 0 }
 0x3e5   : > { %1623 = vmatmul.mubr.msk.bf16.vlgmr.msra.gmra.mrb[4].mxu1 %vm803_vm3, %v796_v4  ;;  %1629 = vmatmul.mubr.msk.bf16.vlgmr.msra.gmra.mrb[8].mxu0 %vm803_vm3, %v797_v3 }
 0x3e6   : > { %1633 = vmatpush3.bf16.xpose.msra.mxu1 %v946_v5  ;;  %1634 = vmatprep.mubr.msk.bf16.mxu1 %vm2260_vm1, %v2259_v16 }
 0x3e7   : > { %1644 = vmatprep.subr.bf16.mxu1 %v2259_v16  ;;  %1640 = vmatprep.mubr.msk.bf16.mxu0 %vm2260_vm1, %v2259_v16 }
 0x3ed   : > { %1635 = vmatmul.mubr.msk.bf16.vlgmr.msra.gmra.mrb[8].mxu1 %vm803_vm3, %v798_v7 }
 0x3ee   : > { %1646 = vmatprep.mubr.msk.bf16.mxu1 %vm2260_vm1, %v2259_v16 }
 0x445   : > { %v844_v8 = vpop.f32.mrb[4].mxu0 }
 0x446   : > { %v988_v9 = vmul.f32 0.35355338, %v844_v8  ;;  %v1618_v10 = vpop.f32.mrb[5].mxu0 }
 0x447   : > { %v847_v11 = vpop.f32.mrb[6].mxu0 }
 0x448   : > { %v1619_v12 = vpop.f32.mrb[7].mxu0  ;;  %v992_v13 = vsel %vm803_vm3, %v988_v9, -inf }
 0x449   : > { %993 = vmax.xlane.f32.xlu0 %v992_v13 }
 0x4b8   : > { %v890_v14 = vpop.f32.mrb[4].mxu1  ;;  %v936_v15 = vpop.f32.mrb[8].mxu0 }
 0x4b9   : > { %v989_v17 = vmul.f32 0.35355338, %v890_v14  ;;  %v990_v18 = vmul.f32 0.35355338, %v936_v15  ;;  %v1624_v19 = vpop.f32.mrb[5].mxu1  ;;  %v1630_v20 = vpop.f32.mrb[9].mxu0 }
 0x4ba   : > { %v893_v21 = vpop.f32.mrb[6].mxu1  ;;  %v939_v22 = vpop.f32.mrb[10].mxu0  ;;  %v1833_v14 = vld [vmem:[#allocation18] sm:$0xff]   ;;  %v1834_v20 = vld [vmem:[#allocation18 + $0x8] sm:$0xff]  }
 0x4bb   : > { %v1625_v23 = vpop.f32.mrb[7].mxu1  ;;  %v1631_v24 = vpop.f32.mrb[11].mxu0  ;;  %v995_v25 = vsel %vm803_vm3, %v989_v17, -inf  ;;  %v998_v26 = vsel %vm803_vm3, %v990_v18, -inf }
 0x4bc   : > { %996 = vmax.xlane.f32.xlu1 %v995_v25  ;;  %999 = vmax.xlane.f32.xlu0 %v998_v26 }
 0x4c0   : > { %v982_v27 = vpop.f32.mrb[8].mxu1 }
 0x4c1   : > { %v991_v28 = vmul.f32 0.35355338, %v982_v27  ;;  %v1636_v29 = vpop.f32.mrb[9].mxu1 }
 0x4c2   : > { %v985_v30 = vpop.f32.mrb[10].mxu1 }
 0x4c3   : > { %v1637_v31 = vpop.f32.mrb[11].mxu1  ;;  %v1001_v32 = vsel %vm803_vm3, %v991_v28, -inf }
 0x4c4   : > { %1002 = vmax.xlane.f32.xlu0 %v1001_v32 }
 0x4cd   : > { %672 = vrot.lane.b32.xlu1 %v650_v56, %s2264_s24 }
 0x4d1   : > { %674 = vrot.lane.b32.xlu1 %v651_v55, %s2264_s24 }
 0x4d5   : > { %676 = vrot.lane.b32.xlu1 %v652_v58, %s2264_s24 }
 0x4d6   : > { %v994_v33 = vpop.xlane.xlu0 %993 }
 0x4d7   : > { %v1004_v38 = vsub.f32 %v988_v9, %v994_v33 }
 0x4d9   : > { %v1008_v42 = vmul.f32 1.442695, %v1004_v38 }
 0x4da   : > { %670 = vrot.lane.b32.xlu0 %v2716_v43, %s2264_s24 }
 0x549   : > { %v997_v34 = vpop.xlane.xlu1 %996  ;;  %v1000_v35 = vpop.xlane.xlu0 %999 }
 0x54a   : > { %v1005_v36 = vsub.f32 %v989_v17, %v997_v34  ;;  %v1006_v37 = vsub.f32 %v990_v18, %v1000_v35 }
 0x54c   : > { %v1010_v39 = vmul.f32 1.442695, %v1005_v36  ;;  %v1012_v40 = vmul.f32 1.442695, %v1006_v37 }
 0x54d   : > { %v673_v41 = vpop.permute.xlu1 %672 }
 0x54e   : > { %1839 = vpow2.f32 %v1010_v39  ;;  %683 = vst.msk [vmem:[#allocation3 + $0x4] sm:$0xf] %vm653_vm2, %v673_v41 }
 0x54f   : > { %1841 = vpow2.f32 %v1012_v40 }
 0x550   : > { %1843 = vpow2.f32 %v1008_v42 }
 0x551   : > { %v675_v44 = vpop.permute.xlu1 %674  ;;  %v1003_v45 = vpop.xlane.xlu0 %1002 }
 0x552   : > { %684 = vst.msk [vmem:[#allocation3 + $0x8] sm:$0xf] %vm653_vm2, %v675_v44  ;;  %v1007_v46 = vsub.f32 %v991_v28, %v1003_v45  ;;  %v1561_v44 = vld [vmem:[#allocation19] ss:$0 sm:$0xff] }
 0x554   : > { %v1014_v43 = vmul.f32 1.442695, %v1007_v46 }
 0x555   : > { %v677_v47 = vpop.permute.xlu1 %676  ;;  %v671_v48 = vpop.permute.xlu0 %670  ;;  %v1037_v49 = vld [vmem:[#allocation3 + $0x4] sm:$0xf] }
 0x556   : > { %1845 = vpow2.f32 %v1014_v43  ;;  %685 = vst.msk [vmem:[#allocation3 + $0xc] sm:$0xf] %vm653_vm2, %v677_v47  ;;  %682 = vst.msk [vmem:[#allocation3] sm:$0xf] %vm653_vm2, %v671_v48  ;;  %v1091_v50 = vsel %vm1043_vm4, %v1037_v49, 0 }
 0x557   : > { %1645 = vmatpush3.bf16.msra.mxu1 %v1091_v50 }
 0x558   : > { %v1840_v51 = vpop.eup %1839  ;;  %1656 = vmatprep.subr.bf16.mxu1 %v2259_v16 }
 0x559   : > { %v1842_v52 = vpop.eup %1841  ;;  %v1019_v53 = vsel %vm803_vm3, %v1840_v51, 0.0  ;;  %v1033_v54 = vpack.c.bf16 %v1840_v51, %v1840_v51  ;;  %v1038_v61 = vld [vmem:[#allocation3 + $0x8] sm:$0xf] }
 0x55a   : > { %1020 = vadd.xlane.f32.xlu0 %v1019_v53  ;;  %v1022_v55 = vsel %vm803_vm3, %v1842_v52, 0.0  ;;  %v1844_v56 = vpop.eup %1843  ;;  %v1137_v3 = vsel %vm1043_vm4, %v1038_v61, 0  ;;  %v1034_v5 = vpack.c.bf16 %v1842_v52, %v1842_v52 }
 0x55b   : > { %1023 = vadd.xlane.f32.xlu1 %v1022_v55  ;;  %1647 = vmatmul.mubr.msk.bf16.vlgmr.msra.gmra.mrb[12].mxu1 %vm803_vm3, %v1033_v54  ;;  %v1032_v63 = vpack.c.bf16 %v1844_v56, %v1844_v56  ;;  %v1016_v4 = vsel %vm803_vm3, %v1844_v56, 0.0 }
 0x55c   : > { %1658 = vmatprep.mubr.msk.bf16.mxu1 %vm2260_vm1, %v2259_v16 }
 0x55d   : > { %v1036_v57 = vld [vmem:[#allocation3] sm:$0xf]  ;;  %v1039_v58 = vld [vmem:[#allocation3 + $0xc] sm:$0xf] }
 0x55e   : > { %v1045_v59 = vsel %vm1043_vm4, %v1036_v57, 0  ;;  %v1183_v60 = vsel %vm1043_vm4, %v1039_v58, 0 }
 0x55f   : > { %1639 = vmatpush3.bf16.msra.mxu0 %v1045_v59  ;;  %1657 = vmatpush3.bf16.msra.mxu1 %v1183_v60 }
 0x560   : > { %v1846_v62 = vpop.eup %1845  ;;  %1650 = vmatprep.subr.bf16.mxu0 %v2259_v16 }
 0x561   : > { %v1025_v0 = vsel %vm803_vm3, %v1846_v62, 0.0  ;;  %v1035_v2 = vpack.c.bf16 %v1846_v62, %v1846_v62 }
 0x562   : > { %1026 = vadd.xlane.f32.xlu0 %v1025_v0  ;;  %1641 = vmatmul.mubr.msk.bf16.vlgmr.msra.gmra.mrb[12].mxu0 %vm803_vm3, %v1032_v63 }
 0x563   : > { %1651 = vmatpush3.bf16.msra.mxu0 %v1137_v3  ;;  %1659 = vmatmul.mubr.msk.bf16.vlgmr.msra.gmra.mrb[16].mxu1 %vm803_vm3, %v1035_v2 }
 0x564   : > { %1652 = vmatprep.mubr.msk.bf16.mxu0 %vm2260_vm1, %v2259_v16  ;;  %1662 = vmatprep.subr.bf16.mxu0 %v2259_v16 }
 0x566   : > { %1017 = vadd.xlane.f32.xlu0 %v1016_v4 }
 0x56a   : > { %1653 = vmatmul.mubr.msk.bf16.vlgmr.msra.gmra.mrb[16].mxu0 %vm803_vm3, %v1034_v5 }
 0x56b   : > { %1666 = vmatprep.mubr.msk.bf16.mxu0 %vm2260_vm1, %v2259_v16  ;;  %1663 = vmatpush3.bf16.msra.mxu0 %v1833_v14 }
 0x56c   : > { %1664 = vmatprep.subr.bf16.mxu0 %v2259_v16 }
 0x56f   : > { %1665 = vmatpush3.bf16.msra.mxu0 %v1834_v20 }
 0x5e7   : > { %v1021_v6 = vpop.xlane.xlu0 %1020 }
 0x5e8   : > { %1847 = vrcp.f32 %v1021_v6  ;;  %v1024_v11 = vpop.xlane.xlu1 %1023 }
 0x5e9   : > { %1849 = vrcp.f32 %v1024_v11 }
 0x5ef   : > { %v1027_v15 = vpop.xlane.xlu0 %1026 }
 0x5f0   : > { %1851 = vrcp.f32 %v1027_v15 }
 0x5f2   : > { %v1848_v7 = vpop.eup %1847 }
 0x5f3   : > { %v1850_v26 = vpop.eup %1849  ;;  %v1018_v33 = vpop.xlane.xlu0 %1017 }
 0x5f4   : > { %1853 = vrcp.f32 %v1018_v33 }
 0x5fa   : > { %v1852_v32 = vpop.eup %1851 }
 0x5fe   : > { %v1854_v34 = vpop.eup %1853 }
 0x62e   : > { %v1127_v8 = vpop.f32.mrb[12].mxu1 }
 0x62f   : > { %v1226_v9 = vmul.f32 %v1848_v7, %v1127_v8  ;;  %v1648_v10 = vpop.f32.mrb[13].mxu1 }
 0x630   : > { %v1130_v12 = vpop.f32.mrb[14].mxu1 }
 0x631   : > { %v1649_v13 = vpop.f32.mrb[15].mxu1  ;;  %1230 = vrot.lane.b32.xlu0 %v1226_v9, %s2265_s12 }
 0x635   : > { %v1081_v17 = vpop.f32.mrb[12].mxu0 }
 0x636   : > { %v1642_v18 = vpop.f32.mrb[13].mxu0  ;;  %v1219_v19 = vpop.f32.mrb[16].mxu1  ;;  %v1225_v37 = vmul.f32 %v1854_v34, %v1081_v17 }
 0x637   : > { %v1084_v21 = vpop.f32.mrb[14].mxu0  ;;  %v1660_v22 = vpop.f32.mrb[17].mxu1  ;;  %v1228_v16 = vmul.f32 %v1852_v32, %v1219_v19 }
 0x638   : > { %v1643_v23 = vpop.f32.mrb[15].mxu0  ;;  %v1222_v24 = vpop.f32.mrb[18].mxu1 }
 0x639   : > { %v1661_v25 = vpop.f32.mrb[19].mxu1 }
 0x63d   : > { %v1173_v27 = vpop.f32.mrb[16].mxu0 }
 0x63e   : > { %v1227_v28 = vmul.f32 %v1850_v26, %v1173_v27  ;;  %v1654_v29 = vpop.f32.mrb[17].mxu0 }
 0x63f   : > { %v1176_v30 = vpop.f32.mrb[18].mxu0 }
 0x640   : > { %1234 = vrot.lane.b32.xlu1 %v1227_v28, %s2266_s23  ;;  %v1655_v31 = vpop.f32.mrb[19].mxu0 }
 0x644   : > { %1238 = vrot.lane.b32.xlu1 %v1228_v16, %s2267_s21 }
 0x6a3   : > { %v1231_v35 = vpop.permute.xlu0 %1230 }
 0x6a4   : > { %v1241_v38 = vsel %vm803_vm3, %v1225_v37, %v1231_v35 }
 0x6b2   : > { %v1235_v36 = vpop.permute.xlu1 %1234 }
 0x6b3   : > { %v1243_v39 = vsel %vm1242_vm5, %v1241_v38, %v1235_v36 }
 0x6b6   : > { %v1239_v40 = vpop.permute.xlu1 %1238 }
 0x6b7   : > { %v1245_v41 = vsel %vm1244_vm6, %v1243_v39, %v1239_v40 }
 0x6b8   : > { %v1246_v42 = vpack.c.bf16 %v1245_v41, %v1245_v41 }
 0x6ba   : > { %1667 = vmatmul.mubr.msk.bf16.vlgmr.msra.gmra.mrb[20].mxu0 %vm541_vm0, %v1246_v42 }
 0x78d   : > { %v1307_v45 = vpop.f32.mrb[20].mxu0 }
 0x78e   : > { %v1308_v46 = vadd.f32 %v1561_v44, %v1307_v45  ;;  %v1668_v43 = vpop.f32.mrb[21].mxu0 }
 0x78f   : > { %v1310_v47 = vpop.f32.mrb[22].mxu0 }
 0x790   : > { %v1313_v48 = vadd.f32 %v1308_v46, %v2692_v1  ;;  %v1669_v49 = vpop.f32.mrb[23].mxu0 }
 0x792   : > { %1314 = vst.msk [vmem:[%s534_s30] sm:$0xff] %vm541_vm0, %v1313_v48 }
 0x793   : > { %2152 = shalt.err (!%p2149_p8)
}
 0x794   : > { %s2153_s4 = scalar_lea.hbm %s2782_s20, 128  ;;  %s2157_s12 = scalar_lea.hbm %s2886_s11, 256 }
 0x795   : > { %p2154_p9 = scmp.ne.s32.totalorder %s2782_s20, %s2153_s4  ;;  %p2158_p3 = scmp.lt.u32.totalorder %s2782_s20, %s2886_s11 }
 0x796   : > { %p2159_p12 = scmp.lt.u32.totalorder %s2157_s12, %s2153_s4  ;;  %p2161_p10 = scmp.lt.u32.totalorder %s2153_s4, %s2782_s20 }
 0x797   : > { %p2155_p1 = pnand %p2154_p9, %p2887_p13 }
 0x798   : > { %p2160_p0 = por %p2159_p12, %p2158_p3 }
 0x799   : > { %p2156_p6 = pneg %p2155_p1 }
 0x79a   : > { %p2162_p4 = por %p2161_p10, %p2160_p0 }
 0x79c   : > { %p2163_p11 = pnand %p2162_p4, %p2156_p6 }
 0x79e   : > { %2166 = shalt.err (!%p2163_p11)
}
 0x79f   : > { %1706 = dma.vmem_to_hbm [thread:$0]  (%p2887_p13), %s2784_s22, 128, %s2782_s20, %s1316_s8  }
 0x7a0 PF: > { %s1342_s6 = sand.u32 1, %s2225_s13   ;;  %p2888_p5 = scmp.ne.s32.totalorder %s2871_s7, 0 }
 0x7a1   : > { %p2889_p7 = scmp.ge.s32.totalorder %s2245_s18, 2  ;;  %s1343_s2 = scalar_lea.sflag [#allocation6], %s1342_s6 }
 0x7a3   : > { %p1741_p2 = pnand %p2889_p7, %p2888_p5 }
 0x7a5   : > { %2220 = dma.done.wait (!%p1741_p2), %s1343_s2, 128  }
 0x7a6   : > { %2222 = vsyncadd (!%p1741_p2), %s1343_s2, 4294967168  ;;  %s33_s18 = sadd.s32 1, %s2245_s18   ;;  %s2890_s3 = smov %s2897_s16 }
 0x7a7   : > { %p30_p8 = scmp.ge.s32.totalorder %s33_s18, 4   ;;  %s2891_s13 = smov %s2229_s14 }
 0x7a8   : > { %s2892_s14 = smov %s2233_s15  ;;  %s2893_s15 = smov %s2576_s5 }
 0x7a9   : > { %s2894_s16 = smov %s2241_s17  ;;  %s2895_s17 = smov %s2890_s3 }
 0x7aa   :  { %32 = sbr.rel (!%p30_p8) target bundleno = 21 (0x15), region = 154 }
 0x7b1   :  { %1348 = vsyncpa [#allocation5], 1 }
 0x7b2   :  { %1350 = vsyncpa [#allocation5 + $0x1], 1 }
 0x7b3   :  { %1351 = vsyncpa [#allocation8], 1 }
 0x7b4   :  { %1353 = vsyncpa [#allocation8 + $0x1], 1 }
 0x7b5   :  { %1354 = vsyncpa [#allocation11], 1 }
 0x7b6   :  { %1355 = vsyncpa [#allocation14], 1 }
 0x7b7   :  { %1356 = vsyncpa [#allocation17], 1 }
 0x7b8   :  { %1357 = vsyncpa [#allocation20], 1 }
 0x7b9   :  { %1358 = vsyncpa [#allocation6], 1 }
 0x7ba   :  { %1360 = vsyncpa [#allocation6 + $0x1], 1 }

// kernel: tpu_custom_call.1
= control target key start
LH: loop header
LB: loop body
LE: loop exit
PB: predicated region body
PF: predicated region fallthrough
CT: control target
= control target key end

     0   :  { %s2328_s0 = inlined_call_operand.hbm [shape: f32[2,8,32], index: 0, kind: input, shape index: {}]   ;;  %s2329_s1 = inlined_call_operand.hbm [shape: f32[2,8,32], index: 1, kind: input, shape index: {}]   ;;  %s2330_s2 = inlined_call_operand.vmem [shape: f32[1,32], index: 2, kind: input, shape index: {}]   ;;  %s2331_s3 = inlined_call_operand.vmem [shape: f32[1,32], index: 3, kind: input, shape index: {}]   ;;  %s2332_s4 = inlined_call_operand.hbm [shape: bf16[32,32], index: 4, kind: input, shape index: {}]   ;;  %s2333_s5 = inlined_call_operand.vmem [shape: f32[1,32], index: 5, kind: input, shape index: {}]   ;;  %s2334_s6 = inlined_call_operand.vmem [shape: bf16[32,64], index: 6, kind: input, shape index: {}]   ;;  %s2335_s7 = inlined_call_operand.vmem [shape: f32[1,64], index: 7, kind: input, shape index: {}]   ;;  %s2336_s8 = inlined_call_operand.hbm [shape: bf16[32,32], index: 8, kind: input, shape index: {}]   ;;  %s2337_s9 = inlined_call_operand.vmem [shape: f32[1,32], index: 9, kind: input, shape index: {}]   ;;  %s2338_s10 = inlined_call_operand.hbm [shape: f32[2,8,32], index: 10, kind: output, shape index: {}]  }
   0x1   :  { %2348 = sst [smem:[#allocation23_spill]] %s2332_s4 }
   0x2   :  { %2349 = sst [smem:[#allocation24_spill]] %s2336_s8 }
   0x3   :  { %2350 = sst [smem:[#allocation25_spill]] %s2337_s9 }
   0x4   :  { %2351 = sst [smem:[#allocation26_spill]] %s2338_s10 }
   0x5   :  { %15 = vsyncpa [#allocation5], 0 }
   0x6   :  { %17 = vsyncpa [#allocation5 + $0x1], 0 }
   0x7   :  { %18 = vsyncpa [#allocation8], 0 }
   0x8   :  { %20 = vsyncpa [#allocation8 + $0x1], 0 }
   0x9   :  { %21 = vsyncpa [#allocation11], 0 }
   0xa   :  { %22 = vsyncpa [#allocation6], 0 }
   0xb   :  { %24 = vsyncpa [#allocation6 + $0x1], 0  ;;  %s1932_s13 = smov 0   ;;  %s1934_s14 = smov 0  }
   0xc   :  { %s1936_s15 = smov 0   ;;  %s1938_s16 = smov 0  }
   0xd   :  { %s1940_s17 = smov 0   ;;  %s1942_s18 = smov 0  }
   0xe LB: > { %2352 = sst [smem:[#allocation18_spill]] %s1839_s13  ;;  %s1963_s19 = sadd.s32 4294967295, %s1859_s18   ;;  %s1859_s18 = sphi %s1942_s18, %s30_s18   ;;  %s1855_s17 = sphi %s1940_s17, %s2381_s17   ;;  %s1851_s16 = sphi %s1938_s16, %s2380_s16   ;;  %s1847_s15 = sphi %s1936_s15, %s2384_s15   ;;  %s1843_s14 = sphi %s1934_s14, %s2383_s14   ;;  %s1839_s13 = sphi %s1932_s13, %s2382_s13  }
   0xf   : > { %2353 = sst [smem:[#allocation19_spill]] %s1855_s17  ;;  %s1376_s20 = sadd.s32 4294967294, %s1859_s18  }
  0x10   : > { %p62_p0 = scmp.ne.s32.totalorder %s1843_s14, %s1839_s13  ;;  %p2340_p1 = scmp.eq.s32.totalorder %s1963_s19, 0 }
  0x11   : > { %p290_p3 = scmp.eq.s32.totalorder %s1376_s20, 1  ;;  %p1377_p5 = scmp.ge.s32.totalorder %s1859_s18, 1 }
  0x12   : > { %p1972_p4 = por %p2340_p1, %p62_p0  ;;  %p297_p7 = scmp.lt.s32.totalorder %s1859_s18, 3 }
  0x13   : > { %p1977_p6 = por %p290_p3, %p62_p0  ;;  %s1861_s24 = smov [#allocation9]  }
  0x14   : > { %s2354_s21 = scalar_select %p1972_p4, 1, 0 }
  0x15   : > { %s2355_s22 = scalar_select %p1977_p6, 1, 0 }
  0x16   : > { %p1982_p8 = pnand %p1377_p5, %p297_p7  ;;  %s315_s25 = sshll.u32 %s1861_s24, 4  ;;  %s1986_s25 = int_to_ptr.vmem [resolvable:$true] %s315_s25 }
  0x17   : > { %2356 = sst [smem:[#allocation20_spill]] %s2355_s22  ;;  %s1862_s27 = smov [#allocation10]  }
  0x18   : > { %s2357_s23 = scalar_select %p1982_p8, 1, 0 }
  0x19   : > { %p1538_p9 = pneg %p1982_p8  ;;  %s337_s28 = sshll.u32 %s1862_s27, 4  ;;  %s1997_s28 = int_to_ptr.vmem [resolvable:$true] %s337_s28 }
  0x1a   : > { %s2359_s4 = sld [smem:[#allocation23_spill]] }
  0x1b   : > { %p1993_p11 = pnand %p1538_p9, %p2340_p1 }
  0x1d   : > { %p1651_p13 = pneg %p1993_p11 }
  0x20   : > { %s1649_s11 = scalar_lea.hbm %s2359_s4, 256 }
  0x21   : > { %p1650_p12 = scmp.ne.s32.totalorder %s2359_s4, %s1649_s11  ;;  %p1656_p5 = scmp.lt.u32.totalorder %s1649_s11, %s2359_s4 }
  0x23   : > { %p1652_p0 = pnand %p1651_p13, %p1650_p12 }
  0x25   : > { %p1653_p3 = pneg %p1652_p0 }
  0x27   : > { %p1658_p7 = pnand %p1656_p5, %p1653_p3 }
  0x29   : > { %1661 = shalt.err (!%p1658_p7)
}
  0x2a   : > { %s1662_s27 = scalar_lea.vmem %s1986_s25, 256  ;;  %p1670_p2 = scmp.lt.s32.totalorder %s1986_s25, %s1986_s25 }
  0x2b   : > { %p1663_p9 = scmp.ne.s32.totalorder %s1986_s25, %s1662_s27  ;;  %p1671_p12 = scmp.lt.s32.totalorder %s1662_s27, %s1662_s27 }
  0x2d   : > { %p1665_p10 = pnand %p1663_p9, %p1651_p13  ;;  %p1672_p0 = por %p1671_p12, %p1670_p2 }
  0x2f   : > { %p1666_p1 = pneg %p1665_p10 }
  0x31   : > { %p1673_p6 = pnand %p1672_p0, %p1666_p1 }
  0x33   : > { %1676 = shalt.err (!%p1673_p6)
}
  0x34   : > { %s1863_s22 = smov 64   ;;  %s1864_s29 = smov 4  }
  0x35   : > { %1541 = dma.hbm_to_vmem [thread:$0]  (!%p1993_p11), %s2359_s4, 256, %s1986_s25, [#allocation8], %s1863_s22, %s1863_s22, %s1864_s29  }
  0x36   : > { %s2360_s8 = sld [smem:[#allocation24_spill]] }
  0x3c   : > { %s1677_s24 = scalar_lea.hbm %s2360_s8, 256 }
  0x3d   : > { %p1678_p2 = scmp.ne.s32.totalorder %s2360_s8, %s1677_s24  ;;  %p1684_p10 = scmp.lt.u32.totalorder %s1677_s24, %s2360_s8 }
  0x3f   : > { %p1680_p1 = pnand %p1678_p2, %p1651_p13 }
  0x41   : > { %p1681_p6 = pneg %p1680_p1 }
  0x43   : > { %p1686_p3 = pnand %p1684_p10, %p1681_p6 }
  0x45   : > { %1689 = shalt.err (!%p1686_p3)
}
  0x46   : > { %s1690_s25 = scalar_lea.vmem %s1997_s28, 256  ;;  %p1698_p12 = scmp.lt.s32.totalorder %s1997_s28, %s1997_s28 }
  0x47   : > { %p1691_p5 = scmp.ne.s32.totalorder %s1997_s28, %s1690_s25  ;;  %p1699_p0 = scmp.lt.s32.totalorder %s1690_s25, %s1690_s25 }
  0x49   : > { %p1693_p7 = pnand %p1691_p5, %p1651_p13  ;;  %p1700_p2 = por %p1699_p0, %p1698_p12 }
  0x4b   : > { %p1694_p9 = pneg %p1693_p7 }
  0x4d   : > { %p1701_p1 = pnand %p1700_p2, %p1694_p9 }
  0x4f   : > { %1704 = shalt.err (!%p1701_p1)
}
  0x50   : > { %1544 = dma.hbm_to_vmem [thread:$0]  (!%p1993_p11), %s2360_s8, 256, %s1997_s28, [#allocation11], %s1863_s22, %s1863_s22, %s1864_s29  }
  0x51   : > { %s42_s13 = sadd.s32 1, %s1855_s17  ;;  %s49_s30 = sadd.s32 1, %s1847_s15 }
  0x52   : > { %p44_p13 = scmp.ge.s32.totalorder %s42_s13, 2  ;;  %p56_p6 = scmp.ne.s32.totalorder %s1847_s15, %s1843_s14 }
  0x53   : > { %p57_p10 = scmp.eq.s32.totalorder %s1859_s18, 0  ;;  %p1558_p3 = scmp.lt.s32.totalorder %s1859_s18, 2 }
  0x54   : > { %s2386_s13 = smov (%p44_p13, %s42_s13), 0  ;;  %p2362_p7 = scmp.eq.s32.totalorder %s1963_s19, 1 }
  0x55   : > { %2361 = sst [smem:[#allocation21_spill]] %s2386_s13  ;;  %p58_p5 = por %p57_p10, %p56_p6 }
  0x56   : > { %p2061_p9 = por %p2362_p7, %p56_p6  ;;  %s46_s11 = ssub.s32 %s1855_s17, %s2386_s13 }
  0x57   : > { %s354_s12 = sand.u32 1, %s1847_s15   ;;  %p47_p12 = scmp.eq.s32.totalorder %s46_s11, 0 }
  0x58   : > { %s2363_s26 = scalar_select %p2061_p9, 1, 0 }
  0x59   : > { %s2068_s28 = sshll.u32 %s354_s12, 3  ;;  %s1382_s22 = sshll.u32 %s1855_s17, 7 }
  0x5a   : > { %s2072_s29 = scalar_select %p47_p12, %s1847_s15, %s49_s30  }
  0x5b   : > { %s2077_s27 = scalar_lea.hbm %s2328_s0, %s1382_s22  ;;  %s358_s25 = scalar_lea.vmem [#allocation4], %s2068_s28 }
  0x5c   : > { %2364 = sst [smem:[#allocation22_spill]] %s2072_s29  ;;  %s365_s9 = sshll.u32 %s358_s25, 4  ;;  %s2086_s9 = int_to_ptr.vmem [resolvable:$true] %s365_s9 }
  0x5d   : > { %p2082_p11 = pnand %p1558_p3, %p58_p5  ;;  %s2091_s20 = scalar_lea.hbm %s2329_s1, %s1382_s22 }
  0x5e   : > { %s355_s24 = scalar_lea.sflag [#allocation5], %s354_s12  ;;  %s1705_s4 = scalar_lea.hbm %s2077_s27, 128 }
  0x5f   : > { %p1706_p0 = scmp.ne.s32.totalorder %s2077_s27, %s1705_s4  ;;  %p1707_p2 = pneg %p2082_p11 }
  0x60   : > { %s1710_s13 = scalar_lea.hbm %s2328_s0, 256  ;;  %p1711_p6 = scmp.lt.u32.totalorder %s2077_s27, %s2328_s0 }
  0x61   : > { %p1708_p1 = pnand %p1707_p2, %p1706_p0  ;;  %p1712_p10 = scmp.lt.u32.totalorder %s1710_s13, %s1705_s4 }
  0x62   : > { %p1714_p5 = scmp.lt.u32.totalorder %s1705_s4, %s2077_s27 }
  0x63   : > { %p1709_p13 = pneg %p1708_p1  ;;  %p1713_p3 = por %p1712_p10, %p1711_p6 }
  0x65   : > { %p1715_p7 = por %p1714_p5, %p1713_p3 }
  0x67   : > { %p1716_p12 = pnand %p1715_p7, %p1709_p13 }
  0x69   : > { %1719 = shalt.err (!%p1716_p12)
}
  0x6a   : > { %s1720_s12 = scalar_lea.vmem %s2086_s9, 128  ;;  %s1865_s8 = smov [#allocation4]  }
  0x6b   : > { %p1721_p0 = scmp.ne.s32.totalorder %s2086_s9, %s1720_s12  ;;  %s1725_s22 = sshll.u32 %s1865_s8, 4  ;;  %s1726_s22 = int_to_ptr.vmem [resolvable:$false] %s1725_s22 }
  0x6c   : > { %s1727_s17 = scalar_lea.vmem %s1726_s22, 256  ;;  %p1728_p4 = scmp.lt.s32.totalorder %s2086_s9, %s1726_s22 }
  0x6d   : > { %p1723_p1 = pnand %p1721_p0, %p1707_p2  ;;  %p1729_p6 = scmp.lt.s32.totalorder %s1727_s17, %s1720_s12 }
  0x6f   : > { %p1724_p9 = pneg %p1723_p1  ;;  %p1730_p10 = por %p1729_p6, %p1728_p4 }
  0x71   : > { %p1731_p3 = pnand %p1730_p10, %p1724_p9 }
  0x73   : > { %1734 = shalt.err (!%p1731_p3)
}
  0x74   : > { %1548 = dma.hbm_to_vmem [thread:$0]  (!%p2082_p11), %s2077_s27, 128, %s2086_s9, %s355_s24  }
  0x75   : > { %s372_s4 = sand.u32 1, %s1859_s18   ;;  %s376_s13 = scalar_lea.vmem [#allocation7], %s2068_s28 }
  0x76   : > { %s384_s29 = sshll.u32 %s376_s13, 4  ;;  %s373_s30 = scalar_lea.sflag [#allocation8], %s372_s4  ;;  %s385_s29 = int_to_ptr.vmem [resolvable:$true] %s384_s29 }
  0x77   : > { %s1735_s11 = scalar_lea.hbm %s2091_s20, 128  ;;  %s1740_s8 = scalar_lea.hbm %s2329_s1, 256 }
  0x78   : > { %p1736_p4 = scmp.ne.s32.totalorder %s2091_s20, %s1735_s11  ;;  %p1741_p5 = scmp.lt.u32.totalorder %s2091_s20, %s2329_s1 }
  0x79   : > { %p1742_p7 = scmp.lt.u32.totalorder %s1740_s8, %s1735_s11  ;;  %p1744_p0 = scmp.lt.u32.totalorder %s1735_s11, %s2091_s20 }
  0x7a   : > { %p1738_p9 = pnand %p1736_p4, %p1707_p2 }
  0x7b   : > { %p1743_p12 = por %p1742_p7, %p1741_p5 }
  0x7c   : > { %p1739_p13 = pneg %p1738_p9 }
  0x7d   : > { %p1745_p1 = por %p1744_p0, %p1743_p12 }
  0x7f   : > { %p1746_p6 = pnand %p1745_p1, %p1739_p13 }
  0x81   : > { %1749 = shalt.err (!%p1746_p6)
}
  0x82   : > { %s1750_s28 = scalar_lea.vmem %s385_s29, 128  ;;  %s1866_s27 = smov [#allocation7]  }
  0x83   : > { %p1751_p10 = scmp.ne.s32.totalorder %s385_s29, %s1750_s28  ;;  %s1755_s9 = sshll.u32 %s1866_s27, 4  ;;  %s1756_s9 = int_to_ptr.vmem [resolvable:$false] %s1755_s9 }
  0x84   : > { %s1757_s24 = scalar_lea.vmem %s1756_s9, 256  ;;  %p1758_p9 = scmp.lt.s32.totalorder %s385_s29, %s1756_s9 }
  0x85   : > { %p1753_p3 = pnand %p1751_p10, %p1707_p2  ;;  %p1759_p8 = scmp.lt.s32.totalorder %s1757_s24, %s1750_s28 }
  0x87   : > { %p1754_p4 = pneg %p1753_p3  ;;  %p1760_p5 = por %p1759_p8, %p1758_p9 }
  0x89   : > { %p1761_p7 = pnand %p1760_p5, %p1754_p4 }
  0x8b   : > { %1764 = shalt.err (!%p1761_p7)
}
  0x8c   : > { %1551 = dma.hbm_to_vmem [thread:$0]  (!%p2082_p11), %s2091_s20, 128, %s385_s29, %s373_s30  }
  0x8d   : > { %p2366_p13 = scmp.ne.s32.totalorder %s2357_s23, 0 }
  0x8e   : > { %s2142_s4 = sand.u32 (!%p2366_p13), 1, %s1843_s14   ;;  %p2367_p8 = scmp.ne.s32.totalorder (!%p2366_p13), %s2354_s21, 0 }
  0x8f   : > { %393 = sbr.rel (%p2366_p13) target bundleno = 1779 (0x6f3), region = 60  ;;  %s2145_s13 = sshll.u32 (!%p2366_p13), %s2142_s4, 3 }
  0x90   : > { %s396_s11 = scalar_lea.sflag (!%p2366_p13), [#allocation5], %s2142_s4  ;;  %s399_s25 = scalar_lea.vmem (!%p2366_p13), [#allocation4], %s2145_s13 }
  0x96   : > { %1818 = dma.done.wait (%p2367_p8), %s396_s11, 128  }
  0x97   : > { %1820 = vsyncadd (%p2367_p8), %s396_s11, 4294967168  ;;  %s404_s23 = sand.u32 1, %s1963_s19   ;;  %s408_s20 = scalar_lea.vmem [#allocation7], %s2145_s13 }
  0x98   : > { %s405_s10 = scalar_lea.sflag [#allocation8], %s404_s23 }
  0x99   : > { %1822 = dma.done.wait (%p2367_p8), %s405_s10, 128  }
  0x9a   : > { %1824 = vsyncadd (%p2367_p8), %s405_s10, 4294967168  ;;  %p2368_p11 = scmp.eq.s32.totalorder %s1963_s19, 0 }
  0x9c   : > { %1826 = dma.done.wait (%p2368_p11), [#allocation8], 256   ;;  %p2369_p2 = pmov %p2368_p11 }
  0x9e   : > { %1828 = vsyncadd (%p2369_p2), [#allocation8], 4294967040  ;;  %p2370_p12 = pmov %p2369_p2 }
  0x9f   : > { %p2371_p0 = pmov %p2369_p2 }
  0xa0   : > { %1830 = dma.done.wait (%p2370_p12), [#allocation11], 256  }
  0xa1   : > { %1832 = vsyncadd (%p2371_p0), [#allocation11], 4294967040  ;;  %vm464_vm0 = vcmask 261120   ;;  %v463_v0 = vld [vmem:[%s399_s25] sm:$0xff]  ;;  %v2167_v1 = vld [vmem:[%s408_s20] sm:$0xff]  ;;  %v1867_v16 = vmov 0.0  }
  0xa2   : > { %v465_v2 = vsel %vm464_vm0, %v463_v0, 0.0  ;;  %v611_v3 = vsel %vm464_vm0, %v2167_v1, 0.0  ;;  %v1623_v14 = vld [vmem:[%s2334_s6] sm:$0xff]   ;;  %1452 = vmatprep.subr.bf16.mxu0 %v1867_v16  ;;  %1460 = vmatprep.subr.bf16.mxu1 %v1867_v16  ;;  %v1624_v17 = vld [vmem:[%s2334_s6 + $0x8] sm:$0xff]   ;;  %vm1868_vm1 = vmmov 0   ;;  %vm576_vm2 = vcmask 60416  }
  0xa3   : > { %466 = vadd.xlane.f32.xlu0 %v465_v2  ;;  %v1625_v15 = vld [vmem:[#allocation9] sm:$0xff]   ;;  %1453 = vmatpush3.bf16.msra.mxu0 %v1623_v14  ;;  %v1626_v18 = vld [vmem:[#allocation9 + $0x8] sm:$0xff]   ;;  %s1869_s11 = smov 120   ;;  %s1870_s25 = smov 112   ;;  %vm726_vm3 = vcmask 64512   ;;  %vm966_vm4 = vcmask 1043456  }
  0xa4   : > { %1461 = vmatpush3.bf16.msra.mxu1 %v1625_v15  ;;  %1454 = vmatprep.subr.bf16.mxu0 %v1867_v16  ;;  %v1391_v26 = vld [vmem:[%s2330_s2] ss:$0 sm:$0xff]  ;;  %s1871_s23 = smov 104   ;;  %s1872_s10 = smov 96   ;;  %vm1165_vm5 = vcmask 130048   ;;  %vm1167_vm6 = vcmask 195584  }
  0xa5   : > { %1456 = vmatprep.mubr.msk.bf16.mxu0 %vm1868_vm1, %v1867_v16  ;;  %1462 = vmatprep.subr.bf16.mxu1 %v1867_v16  ;;  %v1392_v28 = vld [vmem:[%s2331_s3] ss:$0 sm:$0xff]  ;;  %s1873_s20 = smov 8   ;;  %s1874_s19 = smov 16  }
  0xa6   : > { %1464 = vmatprep.mubr.msk.bf16.mxu1 %vm1868_vm1, %v1867_v16  ;;  %v1393_v37 = vld [vmem:[%s2335_s7] ss:$0 sm:$0xff]  ;;  %s1875_s21 = smov 24   ;;  %s2372_s12 = sld [smem:[#allocation25_spill]] }
  0xa7   : > { %612 = vadd.xlane.f32.xlu0 %v611_v3  ;;  %1455 = vmatpush3.bf16.msra.mxu0 %v1624_v17  ;;  %v1403_v42 = vld [vmem:[%s2333_s5] ss:$0 sm:$0xff]  ;;  %s1420_s8 = sshll.u32 %s1851_s16, 7  ;;  %s457_s22 = scalar_lea.vmem [#allocation12], %s2145_s13 }
  0xa8   : > { %1468 = vmatprep.subr.bf16.mxu0 %v1867_v16  ;;  %1463 = vmatpush3.bf16.msra.mxu1 %v1626_v18  ;;  %s1253_s17 = sshll.u32 %s457_s22, 4  ;;  %s2373_s9 = sld [smem:[#allocation26_spill]]  ;;  %s2280_s17 = int_to_ptr.vmem [resolvable:$true] %s1253_s17 }
  0xa9   : > { %1474 = vmatprep.subr.bf16.mxu1 %v1867_v16  ;;  %s1239_s16 = scalar_lea.sflag [#allocation6], %s2142_s4  ;;  %s1765_s13 = scalar_lea.vmem %s2280_s17, 128 }
  0xaa   : > { %p1766_p1 = scmp.ne.s32.totalorder %s2280_s17, %s1765_s13  ;;  %p2374_p6 = scmp.ne.s32.totalorder %s2363_s26, 0 }
  0xac   : > { %p1767_p10 = pnand %p1766_p1, %p2374_p6 }
  0xae   : > { %s2278_s24 = scalar_lea.hbm %s2373_s9, %s1420_s8  ;;  %p1768_p3 = pneg %p1767_p10 }
 0x130   : > { %v467_v4 = vpop.xlane.xlu0 %466 }
 0x131   : > { %v469_v5 = vmul.f32 0.03125, %v467_v4 }
 0x133   : > { %v470_v6 = vsub.f32 %v463_v0, %v469_v5 }
 0x134   : > { %v613_v7 = vpop.xlane.xlu0 %612 }
 0x135   : > { %v615_v8 = vmul.f32 0.03125, %v613_v7  ;;  %v471_v9 = vmul.f32 %v470_v6, %v470_v6 }
 0x137   : > { %v616_v10 = vsub.f32 %v2167_v1, %v615_v8  ;;  %v472_v11 = vsel %vm464_vm0, %v471_v9, 0.0 }
 0x138   : > { %473 = vadd.xlane.f32.xlu1 %v472_v11 }
 0x139   : > { %v617_v12 = vmul.f32 %v616_v10, %v616_v10 }
 0x13b   : > { %v618_v13 = vsel %vm464_vm0, %v617_v12, 0.0 }
 0x13c   : > { %619 = vadd.xlane.f32.xlu1 %v618_v13 }
 0x1c5   : > { %v474_v19 = vpop.xlane.xlu1 %473 }
 0x1c6   : > { %v475_v20 = vmul.f32 0.03125, %v474_v19 }
 0x1c8   : > { %v476_v21 = vadd.f32 1e-05, %v475_v20 }
 0x1c9   : > { %v620_v22 = vpop.xlane.xlu1 %619 }
 0x1ca   : > { %1629 = vrsqrt.f32 %v476_v21  ;;  %v621_v23 = vmul.f32 0.03125, %v620_v22 }
 0x1cc   : > { %v622_v24 = vadd.f32 1e-05, %v621_v23 }
 0x1ce   : > { %1631 = vrsqrt.f32 %v622_v24 }
 0x1d4   : > { %v1630_v25 = vpop.eup %1629 }
 0x1d5   : > { %v478_v27 = vmul.f32 %v1630_v25, %v470_v6 }
 0x1d7   : > { %v486_v29 = vmul.f32 %v1391_v26, %v478_v27 }
 0x1d8   : > { %v1632_v30 = vpop.eup %1631 }
 0x1d9   : > { %v494_v31 = vadd.f32 %v1392_v28, %v486_v29  ;;  %v624_v32 = vmul.f32 %v1632_v30, %v616_v10 }
 0x1db   : > { %v495_v33 = vpack.c.bf16 %v494_v31, %v494_v31  ;;  %v632_v34 = vmul.f32 %v1391_v26, %v624_v32 }
 0x1dd   : > { %1457 = vmatmul.mubr.msk.bf16.vlgmr.msra.gmra.mrb[0].mxu0 %vm464_vm0, %v495_v33  ;;  %v640_v35 = vadd.f32 %v1392_v28, %v632_v34 }
 0x1de   : > { %1470 = vmatprep.mubr.msk.bf16.mxu0 %vm1868_vm1, %v1867_v16 }
 0x1df   : > { %v641_v36 = vpack.c.bf16 %v640_v35, %v640_v35 }
 0x1e1   : > { %1465 = vmatmul.mubr.msk.bf16.vlgmr.msra.gmra.mrb[0].mxu1 %vm464_vm0, %v641_v36 }
 0x1e2   : > { %1476 = vmatprep.mubr.msk.bf16.mxu1 %vm1868_vm1, %v1867_v16 }
 0x2b0   : > { %v556_v38 = vpop.f32.mrb[0].mxu0 }
 0x2b1   : > { %v557_v39 = vadd.f32 %v1393_v37, %v556_v38  ;;  %v1458_v40 = vpop.f32.mrb[1].mxu0 }
 0x2b2   : > { %v559_v41 = vpop.f32.mrb[2].mxu0 }
 0x2b3   : > { %v2209_v43 = vpack.c.bf16 %v557_v39, %v557_v39  ;;  %563 = vrot.lane.b32.xlu0 %v557_v39, %s1869_s11  ;;  %v1459_v44 = vpop.f32.mrb[3].mxu0  ;;  %566 = vrot.lane.b32.xlu1 %v557_v39, %s1870_s25 }
 0x2b4   : > { %v702_v45 = vpop.f32.mrb[0].mxu1 }
 0x2b5   : > { %577 = vst.msk [vmem:[#allocation2] sm:$0xf] %vm576_vm2, %v2209_v43  ;;  %v703_v46 = vadd.f32 %v1403_v42, %v702_v45  ;;  %v1466_v47 = vpop.f32.mrb[1].mxu1 }
 0x2b6   : > { %v705_v48 = vpop.f32.mrb[2].mxu1 }
 0x2b7   : > { %569 = vrot.lane.b32.xlu1 %v557_v39, %s1871_s23  ;;  %712 = vrot.lane.b32.xlu0 %v703_v46, %s1870_s25  ;;  %v1467_v49 = vpop.f32.mrb[3].mxu1  ;;  %v718_v52 = vpack.c.bf16 %v703_v46, %v703_v46 }
 0x2bb   : > { %709 = vrot.lane.b32.xlu1 %v703_v46, %s1869_s11  ;;  %s1876_s11 = smov [#allocation12]  }
 0x2bc   : > { %v722_v50 = vld [vmem:[#allocation2] sm:$0xf]  ;;  %s1769_s25 = sshll.u32 %s1876_s11, 4  ;;  %s1770_s25 = int_to_ptr.vmem [resolvable:$false] %s1769_s25 }
 0x2bd   : > { %v731_v51 = vsel %vm726_vm3, %v722_v50, 0  ;;  %p1772_p4 = scmp.lt.s32.totalorder %s2280_s17, %s1770_s25 }
 0x2be   : > { %1469 = vmatpush3.bf16.xpose.msra.mxu0 %v731_v51 }
 0x2bf   : > { %715 = vrot.lane.b32.xlu1 %v703_v46, %s1871_s23  ;;  %1480 = vmatprep.subr.bf16.mxu0 %v1867_v16  ;;  %s1771_s23 = scalar_lea.vmem %s1770_s25, 256 }
 0x2c0   : > { %p1773_p9 = scmp.lt.s32.totalorder %s1771_s23, %s1765_s13 }
 0x2c2   : > { %p1774_p5 = por %p1773_p9, %p1772_p4 }
 0x2c4   : > { %p1775_p7 = pnand %p1774_p5, %p1768_p3 }
 0x2c5   : > { %1471 = vmatmul.mubr.msk.bf16.vlgmr.msra.gmra.mrb[4].mxu0 %vm726_vm3, %v718_v52 }
 0x2c6   : > { %1482 = vmatprep.mubr.msk.bf16.mxu0 %vm1868_vm1, %v1867_v16 }
 0x325   : > { %v567_v53 = vpop.permute.xlu1 %566  ;;  %v564_v54 = vpop.permute.xlu0 %563 }
 0x326   : > { %v574_v55 = vpack.c.bf16 %v567_v53, %v567_v53  ;;  %v573_v56 = vpack.c.bf16 %v564_v54, %v564_v54 }
 0x328   : > { %579 = vst.msk [vmem:[#allocation2 + $0x8] sm:$0xf] %vm576_vm2, %v574_v55  ;;  %578 = vst.msk [vmem:[#allocation2 + $0x4] sm:$0xf] %vm576_vm2, %v573_v56 }
 0x329   : > { %v570_v57 = vpop.permute.xlu1 %569  ;;  %v713_v63 = vpop.permute.xlu0 %712 }
 0x32a   : > { %v575_v58 = vpack.c.bf16 %v570_v57, %v570_v57  ;;  %v720_v3 = vpack.c.bf16 %v713_v63, %v713_v63 }
 0x32c   : > { %580 = vst.msk [vmem:[#allocation2 + $0xc] sm:$0xf] %vm576_vm2, %v575_v58 }
 0x32d   : > { %v710_v0 = vpop.permute.xlu1 %709 }
 0x32e   : > { %v719_v4 = vpack.c.bf16 %v710_v0, %v710_v0 }
 0x32f   : > { %v724_v59 = vld [vmem:[#allocation2 + $0x8] sm:$0xf]  ;;  %v723_v60 = vld [vmem:[#allocation2 + $0x4] sm:$0xf] }
 0x330   : > { %v823_v61 = vsel %vm726_vm3, %v724_v59, 0  ;;  %v777_v62 = vsel %vm726_vm3, %v723_v60, 0 }
 0x331   : > { %1481 = vmatpush3.bf16.xpose.msra.mxu0 %v823_v61  ;;  %1475 = vmatpush3.bf16.xpose.msra.mxu1 %v777_v62  ;;  %v716_v6 = vpop.permute.xlu1 %715 }
 0x332   : > { %1486 = vmatprep.subr.bf16.mxu1 %v1867_v16  ;;  %1492 = vmatprep.subr.bf16.mxu0 %v1867_v16  ;;  %v721_v7 = vpack.c.bf16 %v716_v6, %v716_v6 }
 0x333   : > { %v725_v2 = vld [vmem:[#allocation2 + $0xc] sm:$0xf] }
 0x334   : > { %v869_v5 = vsel %vm726_vm3, %v725_v2, 0 }
 0x338   : > { %1477 = vmatmul.mubr.msk.bf16.vlgmr.msra.gmra.mrb[4].mxu1 %vm726_vm3, %v719_v4  ;;  %1483 = vmatmul.mubr.msk.bf16.vlgmr.msra.gmra.mrb[8].mxu0 %vm726_vm3, %v720_v3 }
 0x339   : > { %1487 = vmatpush3.bf16.xpose.msra.mxu1 %v869_v5  ;;  %1488 = vmatprep.mubr.msk.bf16.mxu1 %vm1868_vm1, %v1867_v16 }
 0x33a   : > { %1498 = vmatprep.subr.bf16.mxu1 %v1867_v16  ;;  %1494 = vmatprep.mubr.msk.bf16.mxu0 %vm1868_vm1, %v1867_v16 }
 0x340   : > { %1489 = vmatmul.mubr.msk.bf16.vlgmr.msra.gmra.mrb[8].mxu1 %vm726_vm3, %v721_v7 }
 0x341   : > { %1500 = vmatprep.mubr.msk.bf16.mxu1 %vm1868_vm1, %v1867_v16 }
 0x398   : > { %v767_v8 = vpop.f32.mrb[4].mxu0 }
 0x399   : > { %v911_v9 = vmul.f32 0.35355338, %v767_v8  ;;  %v1472_v10 = vpop.f32.mrb[5].mxu0 }
 0x39a   : > { %v770_v11 = vpop.f32.mrb[6].mxu0 }
 0x39b   : > { %v1473_v12 = vpop.f32.mrb[7].mxu0  ;;  %v915_v13 = vsel %vm726_vm3, %v911_v9, -inf }
 0x39c   : > { %916 = vmax.xlane.f32.xlu0 %v915_v13 }
 0x40b   : > { %v813_v14 = vpop.f32.mrb[4].mxu1  ;;  %v859_v15 = vpop.f32.mrb[8].mxu0 }
 0x40c   : > { %v912_v17 = vmul.f32 0.35355338, %v813_v14  ;;  %v913_v18 = vmul.f32 0.35355338, %v859_v15  ;;  %v1478_v19 = vpop.f32.mrb[5].mxu1  ;;  %v1484_v20 = vpop.f32.mrb[9].mxu0 }
 0x40d   : > { %v816_v21 = vpop.f32.mrb[6].mxu1  ;;  %v862_v22 = vpop.f32.mrb[10].mxu0  ;;  %v1627_v14 = vld [vmem:[#allocation10] sm:$0xff]   ;;  %v1628_v20 = vld [vmem:[#allocation10 + $0x8] sm:$0xff]  }
 0x40e   : > { %v1479_v23 = vpop.f32.mrb[7].mxu1  ;;  %v1485_v24 = vpop.f32.mrb[11].mxu0  ;;  %v918_v25 = vsel %vm726_vm3, %v912_v17, -inf  ;;  %v921_v26 = vsel %vm726_vm3, %v913_v18, -inf }
 0x40f   : > { %919 = vmax.xlane.f32.xlu1 %v918_v25  ;;  %922 = vmax.xlane.f32.xlu0 %v921_v26 }
 0x413   : > { %v905_v27 = vpop.f32.mrb[8].mxu1 }
 0x414   : > { %v914_v28 = vmul.f32 0.35355338, %v905_v27  ;;  %v1490_v29 = vpop.f32.mrb[9].mxu1 }
 0x415   : > { %v908_v30 = vpop.f32.mrb[10].mxu1 }
 0x416   : > { %v1491_v31 = vpop.f32.mrb[11].mxu1  ;;  %v924_v32 = vsel %vm726_vm3, %v914_v28, -inf }
 0x417   : > { %925 = vmax.xlane.f32.xlu0 %v924_v32 }
 0x420   : > { %595 = vrot.lane.b32.xlu1 %v573_v56, %s1872_s10 }
 0x424   : > { %597 = vrot.lane.b32.xlu1 %v574_v55, %s1872_s10 }
 0x428   : > { %599 = vrot.lane.b32.xlu1 %v575_v58, %s1872_s10 }
 0x429   : > { %v917_v33 = vpop.xlane.xlu0 %916 }
 0x42a   : > { %v927_v38 = vsub.f32 %v911_v9, %v917_v33 }
 0x42c   : > { %v931_v42 = vmul.f32 1.442695, %v927_v38 }
 0x42d   : > { %593 = vrot.lane.b32.xlu0 %v2209_v43, %s1872_s10 }
 0x49c   : > { %v920_v34 = vpop.xlane.xlu1 %919  ;;  %v923_v35 = vpop.xlane.xlu0 %922 }
 0x49d   : > { %v928_v36 = vsub.f32 %v912_v17, %v920_v34  ;;  %v929_v37 = vsub.f32 %v913_v18, %v923_v35 }
 0x49f   : > { %v933_v39 = vmul.f32 1.442695, %v928_v36  ;;  %v935_v40 = vmul.f32 1.442695, %v929_v37 }
 0x4a0   : > { %v596_v41 = vpop.permute.xlu1 %595 }
 0x4a1   : > { %1633 = vpow2.f32 %v933_v39  ;;  %606 = vst.msk [vmem:[#allocation3 + $0x4] sm:$0xf] %vm576_vm2, %v596_v41 }
 0x4a2   : > { %1635 = vpow2.f32 %v935_v40 }
 0x4a3   : > { %1637 = vpow2.f32 %v931_v42 }
 0x4a4   : > { %v598_v44 = vpop.permute.xlu1 %597  ;;  %v926_v45 = vpop.xlane.xlu0 %925 }
 0x4a5   : > { %607 = vst.msk [vmem:[#allocation3 + $0x8] sm:$0xf] %vm576_vm2, %v598_v44  ;;  %v930_v46 = vsub.f32 %v914_v28, %v926_v45  ;;  %v1415_v44 = vld [vmem:[%s2372_s12] ss:$0 sm:$0xff] }
 0x4a7   : > { %v937_v43 = vmul.f32 1.442695, %v930_v46 }
 0x4a8   : > { %v600_v47 = vpop.permute.xlu1 %599  ;;  %v594_v48 = vpop.permute.xlu0 %593  ;;  %v960_v49 = vld [vmem:[#allocation3 + $0x4] sm:$0xf] }
 0x4a9   : > { %1639 = vpow2.f32 %v937_v43  ;;  %608 = vst.msk [vmem:[#allocation3 + $0xc] sm:$0xf] %vm576_vm2, %v600_v47  ;;  %605 = vst.msk [vmem:[#allocation3] sm:$0xf] %vm576_vm2, %v594_v48  ;;  %v1014_v50 = vsel %vm966_vm4, %v960_v49, 0 }
 0x4aa   : > { %1499 = vmatpush3.bf16.msra.mxu1 %v1014_v50 }
 0x4ab   : > { %v1634_v51 = vpop.eup %1633  ;;  %1510 = vmatprep.subr.bf16.mxu1 %v1867_v16 }
 0x4ac   : > { %v1636_v52 = vpop.eup %1635  ;;  %v942_v53 = vsel %vm726_vm3, %v1634_v51, 0.0  ;;  %v956_v54 = vpack.c.bf16 %v1634_v51, %v1634_v51  ;;  %v961_v61 = vld [vmem:[#allocation3 + $0x8] sm:$0xf] }
 0x4ad   : > { %943 = vadd.xlane.f32.xlu0 %v942_v53  ;;  %v945_v55 = vsel %vm726_vm3, %v1636_v52, 0.0  ;;  %v1638_v56 = vpop.eup %1637  ;;  %v1060_v3 = vsel %vm966_vm4, %v961_v61, 0  ;;  %v957_v5 = vpack.c.bf16 %v1636_v52, %v1636_v52 }
 0x4ae   : > { %946 = vadd.xlane.f32.xlu1 %v945_v55  ;;  %1501 = vmatmul.mubr.msk.bf16.vlgmr.msra.gmra.mrb[12].mxu1 %vm726_vm3, %v956_v54  ;;  %v955_v63 = vpack.c.bf16 %v1638_v56, %v1638_v56  ;;  %v939_v4 = vsel %vm726_vm3, %v1638_v56, 0.0 }
 0x4af   : > { %1512 = vmatprep.mubr.msk.bf16.mxu1 %vm1868_vm1, %v1867_v16 }
 0x4b0   : > { %v959_v57 = vld [vmem:[#allocation3] sm:$0xf]  ;;  %v962_v58 = vld [vmem:[#allocation3 + $0xc] sm:$0xf] }
 0x4b1   : > { %v968_v59 = vsel %vm966_vm4, %v959_v57, 0  ;;  %v1106_v60 = vsel %vm966_vm4, %v962_v58, 0 }
 0x4b2   : > { %1493 = vmatpush3.bf16.msra.mxu0 %v968_v59  ;;  %1511 = vmatpush3.bf16.msra.mxu1 %v1106_v60 }
 0x4b3   : > { %v1640_v62 = vpop.eup %1639  ;;  %1504 = vmatprep.subr.bf16.mxu0 %v1867_v16 }
 0x4b4   : > { %v948_v0 = vsel %vm726_vm3, %v1640_v62, 0.0  ;;  %v958_v2 = vpack.c.bf16 %v1640_v62, %v1640_v62 }
 0x4b5   : > { %949 = vadd.xlane.f32.xlu0 %v948_v0  ;;  %1495 = vmatmul.mubr.msk.bf16.vlgmr.msra.gmra.mrb[12].mxu0 %vm726_vm3, %v955_v63 }
 0x4b6   : > { %1505 = vmatpush3.bf16.msra.mxu0 %v1060_v3  ;;  %1513 = vmatmul.mubr.msk.bf16.vlgmr.msra.gmra.mrb[16].mxu1 %vm726_vm3, %v958_v2 }
 0x4b7   : > { %1506 = vmatprep.mubr.msk.bf16.mxu0 %vm1868_vm1, %v1867_v16  ;;  %1516 = vmatprep.subr.bf16.mxu0 %v1867_v16 }
 0x4b9   : > { %940 = vadd.xlane.f32.xlu0 %v939_v4 }
 0x4bd   : > { %1507 = vmatmul.mubr.msk.bf16.vlgmr.msra.gmra.mrb[16].mxu0 %vm726_vm3, %v957_v5 }
 0x4be   : > { %1520 = vmatprep.mubr.msk.bf16.mxu0 %vm1868_vm1, %v1867_v16  ;;  %1517 = vmatpush3.bf16.msra.mxu0 %v1627_v14 }
 0x4bf   : > { %1518 = vmatprep.subr.bf16.mxu0 %v1867_v16 }
 0x4c2   : > { %1519 = vmatpush3.bf16.msra.mxu0 %v1628_v20 }
 0x53a   : > { %v944_v6 = vpop.xlane.xlu0 %943 }
 0x53b   : > { %1641 = vrcp.f32 %v944_v6  ;;  %v947_v11 = vpop.xlane.xlu1 %946 }
 0x53c   : > { %1643 = vrcp.f32 %v947_v11 }
 0x542   : > { %v950_v15 = vpop.xlane.xlu0 %949 }
 0x543   : > { %1645 = vrcp.f32 %v950_v15 }
 0x545   : > { %v1642_v7 = vpop.eup %1641 }
 0x546   : > { %v1644_v26 = vpop.eup %1643  ;;  %v941_v33 = vpop.xlane.xlu0 %940 }
 0x547   : > { %1647 = vrcp.f32 %v941_v33 }
 0x54d   : > { %v1646_v32 = vpop.eup %1645 }
 0x551   : > { %v1648_v34 = vpop.eup %1647 }
 0x581   : > { %v1050_v8 = vpop.f32.mrb[12].mxu1 }
 0x582   : > { %v1149_v9 = vmul.f32 %v1642_v7, %v1050_v8  ;;  %v1502_v10 = vpop.f32.mrb[13].mxu1 }
 0x583   : > { %v1053_v12 = vpop.f32.mrb[14].mxu1 }
 0x584   : > { %v1503_v13 = vpop.f32.mrb[15].mxu1  ;;  %1153 = vrot.lane.b32.xlu0 %v1149_v9, %s1873_s20 }
 0x588   : > { %v1004_v17 = vpop.f32.mrb[12].mxu0 }
 0x589   : > { %v1496_v18 = vpop.f32.mrb[13].mxu0  ;;  %v1142_v19 = vpop.f32.mrb[16].mxu1  ;;  %v1148_v37 = vmul.f32 %v1648_v34, %v1004_v17 }
 0x58a   : > { %v1007_v21 = vpop.f32.mrb[14].mxu0  ;;  %v1514_v22 = vpop.f32.mrb[17].mxu1  ;;  %v1151_v16 = vmul.f32 %v1646_v32, %v1142_v19 }
 0x58b   : > { %v1497_v23 = vpop.f32.mrb[15].mxu0  ;;  %v1145_v24 = vpop.f32.mrb[18].mxu1 }
 0x58c   : > { %v1515_v25 = vpop.f32.mrb[19].mxu1 }
 0x590   : > { %v1096_v27 = vpop.f32.mrb[16].mxu0 }
 0x591   : > { %v1150_v28 = vmul.f32 %v1644_v26, %v1096_v27  ;;  %v1508_v29 = vpop.f32.mrb[17].mxu0 }
 0x592   : > { %v1099_v30 = vpop.f32.mrb[18].mxu0 }
 0x593   : > { %1157 = vrot.lane.b32.xlu1 %v1150_v28, %s1874_s19  ;;  %v1509_v31 = vpop.f32.mrb[19].mxu0 }
 0x597   : > { %1161 = vrot.lane.b32.xlu1 %v1151_v16, %s1875_s21 }
 0x5f6   : > { %v1154_v35 = vpop.permute.xlu0 %1153 }
 0x5f7   : > { %v1164_v38 = vsel %vm726_vm3, %v1148_v37, %v1154_v35 }
 0x605   : > { %v1158_v36 = vpop.permute.xlu1 %1157 }
 0x606   : > { %v1166_v39 = vsel %vm1165_vm5, %v1164_v38, %v1158_v36 }
 0x609   : > { %v1162_v40 = vpop.permute.xlu1 %1161 }
 0x60a   : > { %v1168_v41 = vsel %vm1167_vm6, %v1166_v39, %v1162_v40 }
 0x60b   : > { %v1169_v42 = vpack.c.bf16 %v1168_v41, %v1168_v41 }
 0x60d   : > { %1521 = vmatmul.mubr.msk.bf16.vlgmr.msra.gmra.mrb[20].mxu0 %vm464_vm0, %v1169_v42 }
 0x6e0   : > { %v1230_v45 = vpop.f32.mrb[20].mxu0 }
 0x6e1   : > { %v1231_v46 = vadd.f32 %v1415_v44, %v1230_v45  ;;  %v1522_v43 = vpop.f32.mrb[21].mxu0 }
 0x6e2   : > { %v1233_v47 = vpop.f32.mrb[22].mxu0 }
 0x6e3   : > { %v1236_v48 = vadd.f32 %v1231_v46, %v2167_v1  ;;  %v1523_v49 = vpop.f32.mrb[23].mxu0 }
 0x6e5   : > { %1237 = vst.msk [vmem:[%s457_s22] sm:$0xff] %vm464_vm0, %v1236_v48 }
 0x6e6   : > { %1778 = shalt.err (!%p1775_p7)
}
 0x6e7   : > { %s1779_s4 = scalar_lea.hbm %s2278_s24, 128  ;;  %s1783_s19 = scalar_lea.hbm %s2373_s9, 256 }
 0x6e8   : > { %p1780_p13 = scmp.ne.s32.totalorder %s2278_s24, %s1779_s4  ;;  %p1784_p2 = scmp.lt.u32.totalorder %s2278_s24, %s2373_s9 }
 0x6e9   : > { %p1785_p12 = scmp.lt.u32.totalorder %s1783_s19, %s1779_s4  ;;  %p1787_p1 = scmp.lt.u32.totalorder %s1779_s4, %s2278_s24 }
 0x6ea   : > { %p1781_p8 = pnand %p1780_p13, %p2374_p6 }
 0x6eb   : > { %p1786_p0 = por %p1785_p12, %p1784_p2 }
 0x6ec   : > { %p1782_p11 = pneg %p1781_p8 }
 0x6ed   : > { %p1788_p10 = por %p1787_p1, %p1786_p0 }
 0x6ef   : > { %p1789_p3 = pnand %p1788_p10, %p1782_p11 }
 0x6f1   : > { %1792 = shalt.err (!%p1789_p3)
}
 0x6f2   : > { %1536 = dma.vmem_to_hbm [thread:$0]  (%p2374_p6), %s2280_s17, 128, %s2278_s24, %s1239_s16  }
 0x6f3 PF: > { %s2375_s30 = sld [smem:[#allocation18_spill]]  ;;  %s2376_s12 = sld [smem:[#allocation20_spill]] }
 0x6f4   : > { %p2378_p9 = scmp.ge.s32.totalorder %s1859_s18, 2 }
 0x6f9   : > { %s1265_s8 = sand.u32 1, %s2375_s30   ;;  %p2377_p4 = scmp.ne.s32.totalorder %s2376_s12, 0 }
 0x6fa   : > { %s1266_s22 = scalar_lea.sflag [#allocation6], %s1265_s8 }
 0x6fb   : > { %p1553_p5 = pnand %p2378_p9, %p2377_p4 }
 0x6fd   : > { %1834 = dma.done.wait (!%p1553_p5), %s1266_s22, 128  }
 0x6fe   : > { %1836 = vsyncadd (!%p1553_p5), %s1266_s22, 4294967168  ;;  %s30_s18 = sadd.s32 1, %s1859_s18   ;;  %s2379_s26 = sld [smem:[#allocation22_spill]] }
 0x6ff   : > { %p27_p7 = scmp.ge.s32.totalorder %s30_s18, 4   ;;  %s2380_s16 = sld [smem:[#allocation19_spill]] }
 0x700   : > { %s2381_s17 = sld [smem:[#allocation21_spill]]  ;;  %s2382_s13 = smov %s1843_s14 }
 0x701   : > { %s2383_s14 = smov %s1847_s15  ;;  %29 = sbr.rel (!%p27_p7) target bundleno = 14 (0xe), region = 130 }
 0x704   : > { %s2384_s15 = smov %s2379_s26 }
 0x708   :  { %1271 = vsyncpa [#allocation5], 1 }
 0x709   :  { %1273 = vsyncpa [#allocation5 + $0x1], 1 }
 0x70a   :  { %1274 = vsyncpa [#allocation8], 1 }
 0x70b   :  { %1276 = vsyncpa [#allocation8 + $0x1], 1 }
 0x70c   :  { %1277 = vsyncpa [#allocation11], 1 }
 0x70d   :  { %1278 = vsyncpa [#allocation6], 1 }
 0x70e   :  { %1280 = vsyncpa [#allocation6 + $0x1], 1 }

</bundles_post_ra>
